<compile_context>
chip_gen: v7x
topology: tpu7x:2x2x1
jax: 0.10.0
libtpu: 0.0.40
codegen_flags: <defaults>
</compile_context>

<pallas_src>
import functools

import numpy as np
import jax
import jax.numpy as jnp
from jax import lax
from jax.experimental import pallas as pl
from jax.experimental.pallas import tpu as pltpu

SELU_ALPHA = 1.6732632423543772
SELU_SCALE = 1.0507009873554805


def _pick_tile_h(Ho, Wo):
    """Largest divisor of Ho whose output-row tile (tile_h*Wo) is 8-row aligned and
    <= 512 rows, preferring >= 2 Ho-tiles so the pipeline / both v7x cores get work."""
    best = None
    for th in range(1, Ho + 1):
        if Ho % th:
            continue
        tm = th * Wo
        if tm % 8 != 0 or tm > 512:
            continue
        if th == Ho and best is not None:
            continue  # prefer a multi-tile grid over one giant block
        best = th
    return best if best is not None else Ho


def _conv_selu_kernel(x_ref, w_ref, o_ref, lhs_ref, *, k, stride, tile_h, Wo, Cin):
    """One grid step = one (batch image, Ho-row tile).

    x_ref  : (1, Hp, Wp, Cin)      bf16 padded NHWC image (index constant over the
                                   Ho-tile axis -> DMA'd once per image, reused)
    w_ref  : (k*k*Cin, Cout)       bf16 fused-K weight matrix (constant -> fetched once)
    o_ref  : (1, tile_h*Wo, Cout)  bf16 output row-tile
    lhs_ref: (tile_h*Wo, k*k*Cin)  bf16 VMEM im2col scratch (LHS of the fused matmul)
    """
    t = pl.program_id(1)
    row0 = t * (tile_h * stride)
    if (tile_h * stride) % 8 == 0:
        row0 = pl.multiple_of(row0, 8)
    tile_m = tile_h * Wo

    # ---- in-kernel im2col, straight from the bf16 ref into the bf16 scratch
    #      (no casts, nothing patch-shaped ever touches HBM).
    for dh in range(k):
        for dw in range(k):
            if stride == 1:
                tap = x_ref[0, pl.ds(row0 + dh, tile_h), pl.ds(dw, Wo), :]
            else:
                span_h = stride * (tile_h - 1) + 1
                span_w = stride * (Wo - 1) + 1
                blk = x_ref[0, pl.ds(row0 + dh, span_h), pl.ds(dw, span_w), :]
                tap = lax.slice(blk, (0, 0, 0), (span_h, span_w, Cin),
                                (stride, stride, 1))
            j = (dh * k + dw) * Cin
            lhs_ref[:, j:j + Cin] = tap.reshape(tile_m, Cin)   # (tile_m, Cin) bf16

    # ---- one fused MXU matmul: K = k*k*Cin, f32 accumulation.
    acc = jnp.dot(lhs_ref[...], w_ref[...], preferred_element_type=jnp.float32)

    # ---- fused SELU epilogue in f32 (exp on the EUP slot; clamp keeps the dead branch
    #      finite; v5e has no bf16 VPU/EUP path so f32 is also the fast path there).
    neg = SELU_ALPHA * (jnp.exp(jnp.minimum(acc, 0.0)) - 1.0)
    y = SELU_SCALE * jnp.where(acc > 0.0, acc, neg)

    # ---- bf16 writeback, no channel zero-padding (lane-dense automatically when Cout is
    #      a multiple of 128; masked stores accepted for small Cout per the review).
    o_ref[0] = y.astype(o_ref.dtype)


def conv_block_forward(x_nchw, weight, *, stride, padding):
    """Forward pass of PyTorch convBlock: Conv2d(k, stride, padding, bias=False) -> SELU."""
    N, Cin, H, W = x_nchw.shape
    Cout, Cin_w, kh, kw = weight.shape
    assert Cin == Cin_w and kh == kw, "square kernels only"
    k = kh
    Ho = (H + 2 * padding - k) // stride + 1
    Wo = (W + 2 * padding - k) // stride + 1
    Hp, Wp = H + 2 * padding, W + 2 * padding
    M = Ho * Wo
    KK = k * k * Cin

    tile_h = _pick_tile_h(Ho, Wo)
    tile_m = tile_h * Wo
    n_ht = Ho // tile_h

    # NCHW -> padded NHWC; cast to bf16 FIRST so the transpose/pad passes move half the bytes.
    xp = jnp.transpose(x_nchw.astype(jnp.bfloat16), (0, 2, 3, 1))
    xp = jnp.pad(xp, ((0, 0), (padding, padding), (padding, padding), (0, 0)))

    # OIHW -> fused-K (k*k*Cin, Cout) weight matrix, bf16.
    # Row ordering (kh, kw, ci) matches the kernel's LHS column ordering.
    w_mat = jnp.transpose(weight, (2, 3, 1, 0)).reshape(KK, Cout).astype(jnp.bfloat16)

    out = pl.pallas_call(
        functools.partial(_conv_selu_kernel, k=k, stride=stride,
                          tile_h=tile_h, Wo=Wo, Cin=Cin),
        out_shape=jax.ShapeDtypeStruct((N, M, Cout), jnp.bfloat16),
        grid=(N, n_ht),
        in_specs=[
            # Whole padded image; constant over the Ho-tile axis -> fetched once per image.
            pl.BlockSpec((1, Hp, Wp, Cin), lambda n, t: (n, 0, 0, 0)),
            # Constant index_map -> weights DMA'd once and reused across the whole grid.
            pl.BlockSpec((KK, Cout), lambda n, t: (0, 0)),
        ],
        out_specs=pl.BlockSpec((1, tile_m, Cout), lambda n, t: (n, t, 0)),
        scratch_shapes=[pltpu.VMEM((tile_m, KK), jnp.bfloat16)],
        compiler_params=pltpu.CompilerParams(
            # Every grid step writes an independent output tile -> both axes parallel,
            # so the N * (Ho/tile_h) steps shard across both v7x TensorCores.
            dimension_semantics=("parallel", "parallel"),
            # Sized for ~half of v7x's 64 MiB/TC VMEM; v5e/v6e (128 MiB) have more
            # headroom but this cap is safe everywhere at these block sizes.
            vmem_limit_bytes=48 * 1024 * 1024,
        ),
    )(xp, w_mat)

    # (N, Ho*Wo, Cout) bf16 -> NCHW f32 (row-major bytes of (M, Cout) == (Ho, Wo, Cout)).
    out_nhwc = out.reshape(N, Ho, Wo, Cout)
    return jnp.transpose(out_nhwc, (0, 3, 1, 2)).astype(jnp.float32)


# --------------------------- pure-JAX reference --------------------------------

def reference_forward(x, weight, stride, padding):
    y = lax.conv_general_dilated(
        x, weight, window_strides=(stride, stride),
        padding=((padding, padding), (padding, padding)),
        dimension_numbers=("NCHW", "OIHW", "NCHW"),
        precision=lax.Precision.HIGHEST)
    return jax.nn.selu(y)


# ----------------------------------- main ---------------------------------------

if __name__ == "__main__":
    key = jax.random.PRNGKey(0)
    kx, kw = jax.random.split(key)

    N, inplanes, outplanes, H, W = 2, 4, 8, 16, 16
    kernel, stride, padding = 3, 1, 1

    x = jax.random.normal(kx, (N, inplanes, H, W), dtype=jnp.float32)
    w = 0.1 * jax.random.normal(kw, (outplanes, inplanes, kernel, kernel), dtype=jnp.float32)

    fwd = jax.jit(functools.partial(conv_block_forward, stride=stride, padding=padding))
    out = jax.block_until_ready(fwd(x, w))
    assert out.shape == (N, outplanes, H, W), out.shape

    ref = reference_forward(x, w, stride, padding)
    # bf16 MXU operands + bf16 writeback (f32 accumulation) vs f32 HIGHEST reference.
    np.testing.assert_allclose(np.asarray(out), np.asarray(ref), rtol=2e-2, atol=2e-2)

    print("KERNEL_OK")
</pallas_src>

<mosaic_0001>
module attributes {stable_mosaic.version = 11 : i64} {
  func.func @_conv_selu_kernel(%arg0: i32, %arg1: i32, %arg2: memref<1x18x18x4xbf16, #tpu.memory_space<vmem>>, %arg3: memref<36x8xbf16, #tpu.memory_space<vmem>>, %arg4: memref<1x128x8xbf16, #tpu.memory_space<vmem>>, %arg5: memref<128x36xbf16, #tpu.memory_space<vmem>>) attributes {dimension_semantics = [#tpu.dimension_semantics<parallel>, #tpu.dimension_semantics<parallel>], iteration_bounds = array<i64: 2, 2>, scalar_prefetch = 0 : i64, scratch_operands = 1 : i64, tpu.core_type = #tpu.core_type<tc>, window_params = [{transform_indices = @transform_0, window_bounds = array<i64: 1, 18, 18, 4>}, {pipeline_mode = #tpu.pipeline_mode<synchronous>, transform_indices = @transform_1, window_bounds = array<i64: 36, 8>}, {transform_indices = @transform_2, window_bounds = array<i64: 1, 128, 8>}]} {
    %c8_i32 = arith.constant 8 : i32
    %0 = arith.muli %arg1, %c8_i32 : i32
    %1 = tpu.assume_multiple %0, 8 : i32
    %c0_i32 = arith.constant 0 : i32
    %2 = arith.addi %1, %c0_i32 : i32
    %c0 = arith.constant 0 : index
    %3 = arith.index_cast %2 : i32 to index
    %c0_0 = arith.constant 0 : index
    %c0_1 = arith.constant 0 : index
    %4 = vector.load %arg2[%c0, %3, %c0_0, %c0_1] : memref<1x18x18x4xbf16, #tpu.memory_space<vmem>>, vector<1x8x16x4xbf16>
    %5 = vector.shape_cast %4 : vector<1x8x16x4xbf16> to vector<8x16x4xbf16>
    %6 = vector.shape_cast %5 : vector<8x16x4xbf16> to vector<128x4xbf16>
    %c0_2 = arith.constant 0 : index
    %c0_3 = arith.constant 0 : index
    %7 = vector.load %arg5[%c0_2, %c0_3] : memref<128x36xbf16, #tpu.memory_space<vmem>>, vector<128x4xbf16>
    tpu.vector_store %arg5[%c0_2, %c0_3], %6 {strides = array<i32>} : memref<128x36xbf16, #tpu.memory_space<vmem>>, vector<128x4xbf16>,
    %c0_i32_4 = arith.constant 0 : i32
    %8 = arith.addi %1, %c0_i32_4 : i32
    %c0_5 = arith.constant 0 : index
    %9 = arith.index_cast %8 : i32 to index
    %c1 = arith.constant 1 : index
    %c0_6 = arith.constant 0 : index
    %10 = vector.load %arg2[%c0_5, %9, %c1, %c0_6] : memref<1x18x18x4xbf16, #tpu.memory_space<vmem>>, vector<1x8x16x4xbf16>
    %11 = vector.shape_cast %10 : vector<1x8x16x4xbf16> to vector<8x16x4xbf16>
    %12 = vector.shape_cast %11 : vector<8x16x4xbf16> to vector<128x4xbf16>
    %c0_7 = arith.constant 0 : index
    %c4 = arith.constant 4 : index
    %13 = vector.load %arg5[%c0_7, %c4] : memref<128x36xbf16, #tpu.memory_space<vmem>>, vector<128x4xbf16>
    tpu.vector_store %arg5[%c0_7, %c4], %12 {strides = array<i32>} : memref<128x36xbf16, #tpu.memory_space<vmem>>, vector<128x4xbf16>,
    %c0_i32_8 = arith.constant 0 : i32
    %14 = arith.addi %1, %c0_i32_8 : i32
    %c0_9 = arith.constant 0 : index
    %15 = arith.index_cast %14 : i32 to index
    %c2 = arith.constant 2 : index
    %c0_10 = arith.constant 0 : index
    %16 = vector.load %arg2[%c0_9, %15, %c2, %c0_10] : memref<1x18x18x4xbf16, #tpu.memory_space<vmem>>, vector<1x8x16x4xbf16>
    %17 = vector.shape_cast %16 : vector<1x8x16x4xbf16> to vector<8x16x4xbf16>
    %18 = vector.shape_cast %17 : vector<8x16x4xbf16> to vector<128x4xbf16>
    %c0_11 = arith.constant 0 : index
    %c8 = arith.constant 8 : index
    %19 = vector.load %arg5[%c0_11, %c8] : memref<128x36xbf16, #tpu.memory_space<vmem>>, vector<128x4xbf16>
    tpu.vector_store %arg5[%c0_11, %c8], %18 {strides = array<i32>} : memref<128x36xbf16, #tpu.memory_space<vmem>>, vector<128x4xbf16>,
    %c1_i32 = arith.constant 1 : i32
    %20 = arith.addi %1, %c1_i32 : i32
    %c0_12 = arith.constant 0 : index
    %21 = arith.index_cast %20 : i32 to index
    %c0_13 = arith.constant 0 : index
    %c0_14 = arith.constant 0 : index
    %22 = vector.load %arg2[%c0_12, %21, %c0_13, %c0_14] : memref<1x18x18x4xbf16, #tpu.memory_space<vmem>>, vector<1x8x16x4xbf16>
    %23 = vector.shape_cast %22 : vector<1x8x16x4xbf16> to vector<8x16x4xbf16>
    %24 = vector.shape_cast %23 : vector<8x16x4xbf16> to vector<128x4xbf16>
    %c0_15 = arith.constant 0 : index
    %c12 = arith.constant 12 : index
    %25 = vector.load %arg5[%c0_15, %c12] : memref<128x36xbf16, #tpu.memory_space<vmem>>, vector<128x4xbf16>
    tpu.vector_store %arg5[%c0_15, %c12], %24 {strides = array<i32>} : memref<128x36xbf16, #tpu.memory_space<vmem>>, vector<128x4xbf16>,
    %c1_i32_16 = arith.constant 1 : i32
    %26 = arith.addi %1, %c1_i32_16 : i32
    %c0_17 = arith.constant 0 : index
    %27 = arith.index_cast %26 : i32 to index
    %c1_18 = arith.constant 1 : index
    %c0_19 = arith.constant 0 : index
    %28 = vector.load %arg2[%c0_17, %27, %c1_18, %c0_19] : memref<1x18x18x4xbf16, #tpu.memory_space<vmem>>, vector<1x8x16x4xbf16>
    %29 = vector.shape_cast %28 : vector<1x8x16x4xbf16> to vector<8x16x4xbf16>
    %30 = vector.shape_cast %29 : vector<8x16x4xbf16> to vector<128x4xbf16>
    %c0_20 = arith.constant 0 : index
    %c16 = arith.constant 16 : index
    %31 = vector.load %arg5[%c0_20, %c16] : memref<128x36xbf16, #tpu.memory_space<vmem>>, vector<128x4xbf16>
    tpu.vector_store %arg5[%c0_20, %c16], %30 {strides = array<i32>} : memref<128x36xbf16, #tpu.memory_space<vmem>>, vector<128x4xbf16>,
    %c1_i32_21 = arith.constant 1 : i32
    %32 = arith.addi %1, %c1_i32_21 : i32
    %c0_22 = arith.constant 0 : index
    %33 = arith.index_cast %32 : i32 to index
    %c2_23 = arith.constant 2 : index
    %c0_24 = arith.constant 0 : index
    %34 = vector.load %arg2[%c0_22, %33, %c2_23, %c0_24] : memref<1x18x18x4xbf16, #tpu.memory_space<vmem>>, vector<1x8x16x4xbf16>
    %35 = vector.shape_cast %34 : vector<1x8x16x4xbf16> to vector<8x16x4xbf16>
    %36 = vector.shape_cast %35 : vector<8x16x4xbf16> to vector<128x4xbf16>
    %c0_25 = arith.constant 0 : index
    %c20 = arith.constant 20 : index
    %37 = vector.load %arg5[%c0_25, %c20] : memref<128x36xbf16, #tpu.memory_space<vmem>>, vector<128x4xbf16>
    tpu.vector_store %arg5[%c0_25, %c20], %36 {strides = array<i32>} : memref<128x36xbf16, #tpu.memory_space<vmem>>, vector<128x4xbf16>,
    %c2_i32 = arith.constant 2 : i32
    %38 = arith.addi %1, %c2_i32 : i32
    %c0_26 = arith.constant 0 : index
    %39 = arith.index_cast %38 : i32 to index
    %c0_27 = arith.constant 0 : index
    %c0_28 = arith.constant 0 : index
    %40 = vector.load %arg2[%c0_26, %39, %c0_27, %c0_28] : memref<1x18x18x4xbf16, #tpu.memory_space<vmem>>, vector<1x8x16x4xbf16>
    %41 = vector.shape_cast %40 : vector<1x8x16x4xbf16> to vector<8x16x4xbf16>
    %42 = vector.shape_cast %41 : vector<8x16x4xbf16> to vector<128x4xbf16>
    %c0_29 = arith.constant 0 : index
    %c24 = arith.constant 24 : index
    %43 = vector.load %arg5[%c0_29, %c24] : memref<128x36xbf16, #tpu.memory_space<vmem>>, vector<128x4xbf16>
    tpu.vector_store %arg5[%c0_29, %c24], %42 {strides = array<i32>} : memref<128x36xbf16, #tpu.memory_space<vmem>>, vector<128x4xbf16>,
    %c2_i32_30 = arith.constant 2 : i32
    %44 = arith.addi %1, %c2_i32_30 : i32
    %c0_31 = arith.constant 0 : index
    %45 = arith.index_cast %44 : i32 to index
    %c1_32 = arith.constant 1 : index
    %c0_33 = arith.constant 0 : index
    %46 = vector.load %arg2[%c0_31, %45, %c1_32, %c0_33] : memref<1x18x18x4xbf16, #tpu.memory_space<vmem>>, vector<1x8x16x4xbf16>
    %47 = vector.shape_cast %46 : vector<1x8x16x4xbf16> to vector<8x16x4xbf16>
    %48 = vector.shape_cast %47 : vector<8x16x4xbf16> to vector<128x4xbf16>
    %c0_34 = arith.constant 0 : index
    %c28 = arith.constant 28 : index
    %49 = vector.load %arg5[%c0_34, %c28] : memref<128x36xbf16, #tpu.memory_space<vmem>>, vector<128x4xbf16>
    tpu.vector_store %arg5[%c0_34, %c28], %48 {strides = array<i32>} : memref<128x36xbf16, #tpu.memory_space<vmem>>, vector<128x4xbf16>,
    %c2_i32_35 = arith.constant 2 : i32
    %50 = arith.addi %1, %c2_i32_35 : i32
    %c0_36 = arith.constant 0 : index
    %51 = arith.index_cast %50 : i32 to index
    %c2_37 = arith.constant 2 : index
    %c0_38 = arith.constant 0 : index
    %52 = vector.load %arg2[%c0_36, %51, %c2_37, %c0_38] : memref<1x18x18x4xbf16, #tpu.memory_space<vmem>>, vector<1x8x16x4xbf16>
    %53 = vector.shape_cast %52 : vector<1x8x16x4xbf16> to vector<8x16x4xbf16>
    %54 = vector.shape_cast %53 : vector<8x16x4xbf16> to vector<128x4xbf16>
    %c0_39 = arith.constant 0 : index
    %c32 = arith.constant 32 : index
    %55 = vector.load %arg5[%c0_39, %c32] : memref<128x36xbf16, #tpu.memory_space<vmem>>, vector<128x4xbf16>
    tpu.vector_store %arg5[%c0_39, %c32], %54 {strides = array<i32>} : memref<128x36xbf16, #tpu.memory_space<vmem>>, vector<128x4xbf16>,
    %c0_40 = arith.constant 0 : index
    %c0_41 = arith.constant 0 : index
    %56 = vector.load %arg5[%c0_40, %c0_41] : memref<128x36xbf16, #tpu.memory_space<vmem>>, vector<128x36xbf16>
    %c0_42 = arith.constant 0 : index
    %c0_43 = arith.constant 0 : index
    %57 = vector.load %arg3[%c0_42, %c0_43] : memref<36x8xbf16, #tpu.memory_space<vmem>>, vector<36x8xbf16>
    %cst = arith.constant dense<0.000000e+00> : vector<128x8xf32>
    %58 = tpu.matmul %56, %57, %cst {dimension_numbers = #tpu.dot_dimension_numbers<[1], [0], [0], [1], [0, 0, 1, 1], [], []>} : vector<128x36xbf16>, vector<36x8xbf16>, vector<128x8xf32> -> vector<128x8xf32>
    %cst_44 = arith.constant 0.000000e+00 : f32
    %59 = vector.broadcast %cst_44 : f32 to vector<128x8xf32>
    %60 = arith.minimumf %58, %59 : vector<128x8xf32>
    %61 = math.exp %60 : vector<128x8xf32>
    %cst_45 = arith.constant 1.000000e+00 : f32
    %62 = vector.broadcast %cst_45 : f32 to vector<128x8xf32>
    %63 = arith.subf %61, %62 : vector<128x8xf32>
    %cst_46 = arith.constant 1.67326319 : f32
    %64 = vector.broadcast %cst_46 : f32 to vector<128x8xf32>
    %65 = arith.mulf %64, %63 : vector<128x8xf32>
    %cst_47 = arith.constant 0.000000e+00 : f32
    %66 = vector.broadcast %cst_47 : f32 to vector<128x8xf32>
    %67 = arith.cmpf ogt, %58, %66 : vector<128x8xf32>
    %68 = arith.select %67, %58, %65 : vector<128x8xi1>, vector<128x8xf32>
    %cst_48 = arith.constant 1.05070102 : f32
    %69 = vector.broadcast %cst_48 : f32 to vector<128x8xf32>
    %70 = arith.mulf %69, %68 : vector<128x8xf32>
    %71 = arith.truncf %70 : vector<128x8xf32> to vector<128x8xbf16>
    %c0_49 = arith.constant 0 : index
    %c0_50 = arith.constant 0 : index
    %c0_51 = arith.constant 0 : index
    %72 = vector.load %arg4[%c0_49, %c0_50, %c0_51] : memref<1x128x8xbf16, #tpu.memory_space<vmem>>, vector<1x128x8xbf16>
    %73 = vector.shape_cast %72 : vector<1x128x8xbf16> to vector<128x8xbf16>
    %74 = vector.shape_cast %71 : vector<128x8xbf16> to vector<1x128x8xbf16>
    tpu.vector_store %arg4[%c0_49, %c0_50, %c0_51], %74 {strides = array<i32>} : memref<1x128x8xbf16, #tpu.memory_space<vmem>>, vector<1x128x8xbf16>,
    return
  }
  func.func @transform_0(%arg0: i32, %arg1: i32) -> (i32, i32, i32, i32) {
    %c0_i32 = arith.constant 0 : i32
    %c0_i32_0 = arith.constant 0 : i32
    %c0_i32_1 = arith.constant 0 : i32
    %c0_i32_2 = arith.constant 0 : i32
    return %arg0, %c0_i32, %c0_i32_0, %c0_i32_1 : i32, i32, i32, i32
  }
  func.func @transform_1(%arg0: i32, %arg1: i32) -> (i32, i32) {
    %c0_i32 = arith.constant 0 : i32
    %c0_i32_0 = arith.constant 0 : i32
    %c0_i32_1 = arith.constant 0 : i32
    return %c0_i32, %c0_i32_0 : i32, i32
  }
  func.func @transform_2(%arg0: i32, %arg1: i32) -> (i32, i32, i32) {
    %c0_i32 = arith.constant 0 : i32
    %c0_i32_0 = arith.constant 0 : i32
    return %arg0, %arg1, %c0_i32 : i32, i32, i32
  }
}

</mosaic_0001>

<bundles_post_ra>
// kernel: conv_block_forward.1
= control target key start
LH: loop header
LB: loop body
LE: loop exit
PB: predicated region body
PF: predicated region fallthrough
CT: control target
= control target key end

     0   :  { %s2710_s9 = smov 0   ;;  %s2712_s10 = smov 0   ;;  %s3420_s0 = inlined_call_operand.vmem [shape: bf16[2,18,18,4], index: 0, kind: input, shape index: {}]   ;;  %s3421_s1 = inlined_call_operand.vmem [shape: bf16[36,8], index: 1, kind: input, shape index: {}]   ;;  %s3422_s2 = inlined_call_operand.vmem [shape: bf16[2,256,8], index: 2, kind: output, shape index: {}]  }
   0x1   :  { %s2714_s11 = smov 0   ;;  %s2716_s12 = smov 0  }
   0x2   :  { %s2718_s13 = smov 0  }
   0x3 LB: > { %s21_s14 = sadd.s32 1, %s2677_s11  ;;  %s24_s15 = sadd.s32 1, %s2681_s12  ;;  %s2685_s13 = sphi %s2718_s13, %s12_s13   ;;  %s2681_s12 = sphi %s2716_s12, %s3430_s12   ;;  %s2677_s11 = sphi %s2714_s11, %s3429_s11   ;;  %s2673_s10 = sphi %s2712_s10, %s3428_s10   ;;  %s2669_s9 = sphi %s2710_s9, %s3427_s9  }
   0x4   : > { %p22_p0 = scmp.ge.s32.totalorder %s21_s14, 2  ;;  %p2200_p1 = scmp.ge.s32.totalorder %s2685_s13, 1 }
   0x5   : > { %p126_p2 = scmp.lt.s32.totalorder %s2685_s13, 5 }
   0x6   : > { %s3432_s14 = smov (%p22_p0, %s21_s14), 0  ;;  %s3434_s15 = smov (!%p22_p0, %s24_s15), %s2681_s12 }
   0x7   : > { %p127_p3 = pnand %p2200_p1, %p126_p2  ;;  %p26_p4 = scmp.ge.s32.totalorder %s3434_s15, 2 }
   0x8   : > { %p152_p5 = scmp.lt.s32.totalorder (!%p127_p3), %s2673_s10, 1  ;;  %s2481_s16 = smul.u32 (!%p127_p3), 96, %s2669_s9  ;;  %vm569_vm0 = vcmask (!%p127_p3), 1042432   ;;  %vm570_vm1 = vcmask (!%p127_p3), 1046532   ;;  %vm269_vm3 = vsmask.f32 (!%p127_p3), 3328 }
   0x9   : > { %s3436_s15 = smov (%p26_p4, %s3434_s15), 0  ;;  %130 = sbr.rel (%p127_p3) target bundleno = 540 (0x21c), region = 28 }
   0xa   : > { %vm2751_vm2 = vmor (!%p127_p3), %vm569_vm0, %vm570_vm1  ;;  %s2687_s22 = smov (!%p127_p3), 12   ;;  %vm270_vm4 = vsmask.f32 (!%p127_p3), 7440  ;;  %s2688_s23 = smov (!%p127_p3), 8   ;;  %vm236_vm6 = vcmask (!%p127_p3), 31744   ;;  %vm512_vm7 = vcmask (!%p127_p3), 64544  }
   0xb   : > { %vm2805_vm5 = vmor (!%p127_p3), %vm269_vm3, %vm270_vm4  ;;  %s2689_s24 = smov (!%p127_p3), 4   ;;  %s2690_s25 = smov (!%p127_p3), 16   ;;  %vm676_vm8 = vcmask (!%p127_p3), 97344   ;;  %vm769_vm9 = vcmask (!%p127_p3), 130144   ;;  %vm1792_vm10 = vcmask (!%p127_p3), 1041408   ;;  %vm1042_vm11 = vcmask (!%p127_p3), 162944  }
   0xc   : > { %s2691_s26 = smov (!%p127_p3), 20   ;;  %s2692_s27 = smov (!%p127_p3), 24   ;;  %vm1203_vm12 = vcmask (!%p127_p3), 195744   ;;  %vm1296_vm13 = vcmask (!%p127_p3), 228544   ;;  %vm1569_vm14 = vcmask (!%p127_p3), 261344   ;;  %vm1730_vm15 = vcmask (!%p127_p3), 294144  }
   0xd   : > { %s2693_s28 = smov (!%p127_p3), 28   ;;  %s2694_s3 = smov (!%p127_p3), 32   ;;  %vm1767_vm0 = vcmask (!%p127_p3), 293888   ;;  %vm2085_vm1 = vcmask (!%p127_p3), 60416  }
   0xe   : > { %s2202_s8 = sshll.u32 (!%p127_p3), %s2669_s9, 4 }
   0xf   : > { %p160_p6 = scmp.lt.s32.totalorder (!%p127_p3), %s2202_s8, 31 }
  0x10   : > { %s3438_s10 = smov (!%p152_p5, %s2673_s10), 1 }
  0x11   : > { %s2539_s17 = smul.u32 216, %s3438_s10  ;;  %s3440_s8 = smov (!%p160_p6, %s2202_s8), 31 }
  0x12   : > { %s2203_s9 = sshll.u32 %s3438_s10, 5 }
  0x13   : > { %s156_s20 = scalar_lea.vmem %s3420_s0, %s2539_s17 }
  0x14   : > { %s2749_s21 = scalar_lea.vmem %s156_s20, %s2481_s16  ;;  %s3316_s16 = sadd.s32 %s2203_s9, %s3440_s8 }
  0x15   : > { %v2588_v1 = vld [vmem:[%s2749_s21 + $0x3c] sm:$0xff]   ;;  %v2589_v2 = vld [vmem:[%s2749_s21 + $0xc] sm:$0xff]   ;;  %v534_v6 = vld [vmem:[%s2749_s21 + $0x34] sm:$0xf]  ;;  %s2204_s10 = sshll.u32 %s3316_s16, 2 }
  0x16   : > { %753 = vrot.lane.b32.xlu1 %v2588_v1, %s2687_s22  ;;  %v2590_v3 = vld [vmem:[%s2749_s21 + $0x48] sm:$0xff]   ;;  %745 = vrot.lane.b32.xlu0 %v2589_v2, %s2687_s22  ;;  %v2591_v4 = vld [vmem:[%s2749_s21 + $0x18] sm:$0xff]   ;;  %v602_v9 = vrot.slane %v534_v6, 5  ;;  %s3331_s19 = scalar_lea.vmem %s3422_s2, %s2204_s10 }
  0x17   : > { %v533_v5 = vld [vmem:[%s2749_s21 + $0x30] sm:$0xe]  ;;  %v535_v7 = vld [vmem:[%s2749_s21 + $0x38] sm:$0x1]  ;;  %v521_v11 = vld [vmem:[%s2749_s21] sm:$0xe] }
  0x18   : > { %v2228_v8 = vrot.slane %v533_v5, 9  ;;  %v605_v10 = vrot.slane %v535_v7, 5  ;;  %v522_v12 = vld [vmem:[%s2749_s21 + $0x4] sm:$0xf]  ;;  %v523_v13 = vld [vmem:[%s2749_s21 + $0x8] sm:$0x1] }
  0x19   : > { %v2224_v14 = vrot.slane %v521_v11, 9  ;;  %v604_v16 = vrot.slane %v602_v9, 4  ;;  %v574_v17 = vrot.slane %v522_v12, 5  ;;  %v577_v18 = vrot.slane %v523_v13, 5  ;;  %v536_v19 = vld [vmem:[%s2749_s21 + $0x3c] sm:$0xe] }
  0x1a   : > { %755 = vrot.lane.b32.xlu1 %v2590_v3, %s2687_s22  ;;  %747 = vrot.lane.b32.xlu0 %v2591_v4, %s2687_s22  ;;  %v603_v15 = vsel %vm2751_vm2, %v2228_v8, %v602_v9  ;;  %v537_v20 = vld [vmem:[%s2749_s21 + $0x40] sm:$0xf]  ;;  %v538_v21 = vld [vmem:[%s2749_s21 + $0x44] sm:$0x1]  ;;  %v2229_v22 = vrot.slane %v536_v19, 9 }
  0x1b   : > { %v606_v23 = vsel %vm2751_vm2, %v604_v16, %v605_v10  ;;  %v575_v24 = vsel %vm2751_vm2, %v2224_v14, %v574_v17  ;;  %v576_v25 = vrot.slane %v574_v17, 4  ;;  %v609_v26 = vrot.slane %v537_v20, 5  ;;  %v524_v27 = vld [vmem:[%s2749_s21 + $0xc] sm:$0xe]  ;;  %v525_v28 = vld [vmem:[%s2749_s21 + $0x10] sm:$0xf] }
  0x1c   : > { %v2236_v29 = vcombine.low %v603_v15, %v606_v23  ;;  %v612_v30 = vrot.slane %v538_v21, 5  ;;  %v526_v31 = vld [vmem:[%s2749_s21 + $0x14] sm:$0x1]  ;;  %v2225_v32 = vrot.slane %v524_v27, 9  ;;  %v581_v33 = vrot.slane %v525_v28, 5 }
  0x1d   : > { %v578_v34 = vsel %vm2751_vm2, %v576_v25, %v577_v18  ;;  %v610_v35 = vsel %vm2751_vm2, %v2229_v22, %v609_v26  ;;  %v611_v36 = vrot.slane %v609_v26, 4  ;;  %v584_v37 = vrot.slane %v526_v31, 5  ;;  %v248_v38 = vld [vmem:[%s2749_s21 + $0xc] sm:$0xf]  ;;  %v249_v39 = vld [vmem:[%s2749_s21 + $0x10] sm:$0xf] }
  0x1e   : > { %660 = vrot.lane.b32.xlu1 %v2236_v29, %s2688_s23  ;;  %v2232_v40 = vcombine.low %v575_v24, %v578_v34  ;;  %v582_v41 = vsel %vm2751_vm2, %v2225_v32, %v581_v33  ;;  %v583_v42 = vrot.slane %v581_v33, 4  ;;  %v250_v43 = vld [vmem:[%s2749_s21 + $0x14] sm:$0x1]  ;;  %v297_v44 = vshrl.u32 %v248_v38, 16  ;;  %v245_v45 = vld [vmem:[%s2749_s21] sm:$0xf] }
  0x1f   : > { %v613_v46 = vsel %vm2751_vm2, %v611_v36, %v612_v30  ;;  %v300_v47 = vshll.u32 %v248_v38, 16  ;;  %v306_v48 = vshll.u32 %v249_v39, 16  ;;  %v310_v49 = vshrl.u32 %v249_v39, 16  ;;  %v246_v50 = vld [vmem:[%s2749_s21 + $0x4] sm:$0xf] }
  0x20   : > { %652 = vrot.lane.b32.xlu0 %v2232_v40, %s2688_s23  ;;  %v2237_v51 = vcombine.low %v610_v35, %v613_v46  ;;  %v585_v52 = vsel %vm2751_vm2, %v583_v42, %v584_v37  ;;  %v299_v53 = vrot.slane %v297_v44, 4  ;;  %v316_v54 = vshll.u32 %v250_v43, 16  ;;  %v247_v55 = vld [vmem:[%s2749_s21 + $0x8] sm:$0x1]  ;;  %v260_v60 = vld [vmem:[%s2749_s21 + $0x3c] sm:$0xf] }
  0x21   : > { %v2233_v56 = vcombine.low %v582_v41, %v585_v52  ;;  %v302_v57 = vrot.slane %v300_v47, 5  ;;  %v308_v58 = vrot.slane %v306_v48, 5  ;;  %v312_v59 = vrot.slane %v310_v49, 4  ;;  %v261_v6 = vld [vmem:[%s2749_s21 + $0x40] sm:$0xf] }
  0x22   : > { %662 = vrot.lane.b32.xlu1 %v2237_v51, %s2688_s23  ;;  %v318_v61 = vrot.slane %v316_v54, 5  ;;  %v273_v62 = vshrl.u32 %v245_v45, 16  ;;  %v276_v63 = vshll.u32 %v245_v45, 16  ;;  %v282_v1 = vshll.u32 %v246_v50, 16  ;;  %v262_v16 = vld [vmem:[%s2749_s21 + $0x44] sm:$0x1] }
  0x23   : > { %v303_v2 = vor.u32 %v302_v57, %v299_v53  ;;  %v313_v3 = vor.u32 %v312_v59, %v308_v58  ;;  %v286_v4 = vshrl.u32 %v246_v50, 16  ;;  %v292_v5 = vshll.u32 %v247_v55, 16  ;;  %v257_v21 = vld [vmem:[%s2749_s21 + $0x30] sm:$0xf]  ;;  %v258_v26 = vld [vmem:[%s2749_s21 + $0x34] sm:$0xf] }
  0x24   : > { %654 = vrot.lane.b32.xlu0 %v2233_v56, %s2688_s23  ;;  %v275_v8 = vrot.slane %v273_v62, 4  ;;  %v278_v9 = vrot.slane %v276_v63, 5  ;;  %v284_v10 = vrot.slane %v282_v1, 5  ;;  %v393_v11 = vshrl.u32 %v260_v60, 16  ;;  %v259_v37 = vld [vmem:[%s2749_s21 + $0x38] sm:$0x1] }
  0x25   : > { %v304_v12 = vrot.slane %v303_v2, 4  ;;  %v314_v13 = vrot.slane %v313_v3, 4  ;;  %v288_v14 = vrot.slane %v286_v4, 4  ;;  %v294_v15 = vrot.slane %v292_v5, 5  ;;  %v2278_v40 = vld [vmem:[%s2749_s21 + $0x3c] sm:$0xf] }
  0x26   : > { %v279_v17 = vor.u32 %v278_v9, %v275_v8  ;;  %v395_v18 = vrot.slane %v393_v11, 4  ;;  %v396_v19 = vshll.u32 %v260_v60, 16  ;;  %v402_v20 = vshll.u32 %v261_v6, 16  ;;  %v2279_v45 = vld [vmem:[%s2749_s21 + $0x40] sm:$0xf] }
  0x27   : > { %v309_v22 = vsel %vm2805_vm5, %v304_v12, %v308_v58  ;;  %v319_v23 = vsel %vm2805_vm5, %v314_v13, %v318_v61  ;;  %v289_v24 = vor.u32 %v288_v14, %v284_v10  ;;  %v406_v25 = vshrl.u32 %v261_v6, 16  ;;  %v2280_v56 = vld [vmem:[%s2749_s21 + $0x44] sm:$0x1]  ;;  %v2266_v59 = vld [vmem:[%s2749_s21 + $0xc] sm:$0xf] }
  0x28   : > { %v2217_v27 = vcombine.low %v309_v22, %v319_v23  ;;  %v280_v28 = vrot.slane %v279_v17, 4  ;;  %v398_v29 = vrot.slane %v396_v19, 5  ;;  %v404_v30 = vrot.slane %v402_v20, 5  ;;  %v2267_v1 = vld [vmem:[%s2749_s21 + $0x10] sm:$0xf] }
  0x29   : > { %v290_v31 = vrot.slane %v289_v24, 4  ;;  %v408_v32 = vrot.slane %v406_v25, 4  ;;  %v412_v33 = vshll.u32 %v262_v16, 16  ;;  %v369_v34 = vshrl.u32 %v257_v21, 16  ;;  %v2268_v13 = vld [vmem:[%s2749_s21 + $0x14] sm:$0x1] }
  0x2a   : > { %490 = vrot.lane.b32.xlu1 %v2217_v27, %s2689_s24  ;;  %v285_v35 = vsel %vm2805_vm5, %v280_v28, %v284_v10  ;;  %v399_v36 = vor.u32 %v398_v29, %v395_v18  ;;  %v372_v38 = vshll.u32 %v257_v21, 16  ;;  %v378_v39 = vshll.u32 %v258_v26, 16  ;;  %v2281_v16 = vld [vmem:[%s2749_s21 + $0x48] sm:$0xf]  ;;  %v2282_v28 = vld [vmem:[%s2749_s21 + $0x4c] sm:$0xf] }
  0x2b   : > { %v295_v41 = vsel %vm2805_vm5, %v290_v31, %v294_v15  ;;  %v409_v42 = vor.u32 %v408_v32, %v404_v30  ;;  %v414_v43 = vrot.slane %v412_v33, 5  ;;  %v371_v44 = vrot.slane %v369_v34, 4  ;;  %v2283_v29 = vld [vmem:[%s2749_s21 + $0x50] sm:$0x1] }
  0x2c   : > { %v2216_v46 = vcombine.low %v285_v35, %v295_v41  ;;  %v400_v47 = vrot.slane %v399_v36, 4  ;;  %v374_v48 = vrot.slane %v372_v38, 5  ;;  %v380_v49 = vrot.slane %v378_v39, 5  ;;  %v2269_v35 = vld [vmem:[%s2749_s21 + $0x18] sm:$0xf] }
  0x2d   : > { %v410_v50 = vrot.slane %v409_v42, 4  ;;  %v382_v51 = vshrl.u32 %v258_v26, 16  ;;  %v388_v52 = vshll.u32 %v259_v37, 16  ;;  %v899_v53 = vshrl.u32 %v2278_v40, 16 }
  0x2e   : > { %488 = vrot.lane.b32.xlu0 %v2216_v46, %s2689_s24  ;;  %v405_v54 = vsel %vm2805_vm5, %v400_v47, %v404_v30  ;;  %v375_v55 = vor.u32 %v374_v48, %v371_v44  ;;  %v902_v57 = vshll.u32 %v2278_v40, 16  ;;  %v908_v58 = vshll.u32 %v2279_v45, 16  ;;  %v2270_v40 = vld [vmem:[%s2749_s21 + $0x1c] sm:$0xf] }
  0x2f   : > { %v415_v60 = vsel %vm2805_vm5, %v410_v50, %v414_v43  ;;  %v384_v61 = vrot.slane %v382_v51, 4  ;;  %v390_v62 = vrot.slane %v388_v52, 5  ;;  %v901_v63 = vrot.slane %v899_v53, 4  ;;  %v2310_v50 = vld [vmem:[%s2749_s21 + $0x3c] sm:$0xe] }
  0x30   : > { %v2221_v2 = vcombine.low %v405_v54, %v415_v60  ;;  %v376_v3 = vrot.slane %v375_v55, 4  ;;  %v904_v4 = vrot.slane %v902_v57, 5  ;;  %v910_v5 = vrot.slane %v908_v58, 5  ;;  %v2311_v55 = vld [vmem:[%s2749_s21 + $0x40] sm:$0xf] }
  0x31   : > { %v385_v6 = vor.u32 %v384_v61, %v380_v49  ;;  %v912_v8 = vshrl.u32 %v2279_v45, 16  ;;  %v918_v9 = vshll.u32 %v2280_v56, 16  ;;  %v803_v10 = vshrl.u32 %v2266_v59, 16  ;;  %v2271_v45 = vld [vmem:[%s2749_s21 + $0x20] sm:$0x1] }
  0x32   : > { %498 = vrot.lane.b32.xlu1 %v2221_v2, %s2689_s24  ;;  %v381_v11 = vsel %vm2805_vm5, %v376_v3, %v380_v49  ;;  %v905_v12 = vor.u32 %v904_v4, %v901_v63  ;;  %v806_v14 = vshll.u32 %v2266_v59, 16  ;;  %v812_v15 = vshll.u32 %v2267_v1, 16 }
  0x33   : > { %v386_v17 = vrot.slane %v385_v6, 4  ;;  %v914_v18 = vrot.slane %v912_v8, 4  ;;  %v920_v19 = vrot.slane %v918_v9, 5  ;;  %v805_v20 = vrot.slane %v803_v10, 4  ;;  %v2298_v6 = vld [vmem:[%s2749_s21 + $0xc] sm:$0xe] }
  0x34   : > { %v906_v21 = vrot.slane %v905_v12, 4  ;;  %v808_v22 = vrot.slane %v806_v14, 5  ;;  %v814_v23 = vrot.slane %v812_v15, 5  ;;  %v816_v24 = vshrl.u32 %v2267_v1, 16  ;;  %v2299_v12 = vld [vmem:[%s2749_s21 + $0x10] sm:$0xf] }
  0x35   : > { %v391_v25 = vsel %vm2805_vm5, %v386_v17, %v390_v62  ;;  %v915_v26 = vor.u32 %v914_v18, %v910_v5  ;;  %v822_v27 = vshll.u32 %v2268_v13, 16  ;;  %v923_v30 = vshrl.u32 %v2281_v16, 16  ;;  %v2300_v17 = vld [vmem:[%s2749_s21 + $0x14] sm:$0x1] }
  0x36   : > { %v2220_v31 = vcombine.low %v381_v11, %v391_v25  ;;  %v911_v32 = vsel %vm2805_vm5, %v906_v21, %v910_v5  ;;  %v809_v33 = vor.u32 %v808_v22, %v805_v20  ;;  %v818_v34 = vrot.slane %v816_v24, 4  ;;  %v2312_v5 = vld [vmem:[%s2749_s21 + $0x44] sm:$0x1]  ;;  %v2313_v22 = vld [vmem:[%s2749_s21 + $0x48] sm:$0xe] }
  0x37   : > { %v916_v36 = vrot.slane %v915_v26, 4  ;;  %v824_v37 = vrot.slane %v822_v27, 5  ;;  %v925_v38 = vrot.slane %v923_v30, 4  ;;  %v926_v39 = vshll.u32 %v2281_v16, 16  ;;  %v2314_v27 = vld [vmem:[%s2749_s21 + $0x4c] sm:$0xf] }
  0x38   : > { %496 = vrot.lane.b32.xlu0 %v2220_v31, %s2689_s24  ;;  %v810_v41 = vrot.slane %v809_v33, 4  ;;  %v819_v42 = vor.u32 %v818_v34, %v814_v23  ;;  %v932_v43 = vshll.u32 %v2282_v28, 16  ;;  %v936_v44 = vshrl.u32 %v2282_v28, 16  ;;  %v2315_v28 = vld [vmem:[%s2749_s21 + $0x50] sm:$0x1] }
  0x39   : > { %v921_v46 = vsel %vm2805_vm5, %v916_v36, %v920_v19  ;;  %v928_v47 = vrot.slane %v926_v39, 5  ;;  %v942_v48 = vshll.u32 %v2283_v29, 16  ;;  %v827_v49 = vshrl.u32 %v2269_v35, 16  ;;  %v2301_v33 = vld [vmem:[%s2749_s21 + $0x18] sm:$0xe] }
  0x3a   : > { %v2294_v51 = vcombine.low %v911_v32, %v921_v46  ;;  %v815_v52 = vsel %vm2805_vm5, %v810_v41, %v814_v23  ;;  %v820_v53 = vrot.slane %v819_v42, 4  ;;  %v934_v54 = vrot.slane %v932_v43, 5  ;;  %v2303_v39 = vld [vmem:[%s2749_s21 + $0x20] sm:$0x1] }
  0x3b   : > { %v929_v56 = vor.u32 %v928_v47, %v925_v38  ;;  %v938_v57 = vrot.slane %v936_v44, 4  ;;  %v944_v58 = vrot.slane %v942_v48, 5  ;;  %v829_v59 = vrot.slane %v827_v49, 4  ;;  %v2302_v38 = vld [vmem:[%s2749_s21 + $0x1c] sm:$0xf] }
  0x3c   : > { %1026 = vrot.lane.b32.xlu1 %v2294_v51, %s2690_s25  ;;  %v825_v60 = vsel %vm2805_vm5, %v820_v53, %v824_v37  ;;  %v830_v61 = vshll.u32 %v2269_v35, 16  ;;  %v836_v62 = vshll.u32 %v2270_v40, 16  ;;  %v840_v63 = vshrl.u32 %v2270_v40, 16  ;;  %v2376_v44 = vld [vmem:[%s2749_s21 + $0x48] sm:$0xf] }
  0x3d   : > { %v2290_v1 = vcombine.low %v815_v52, %v825_v60  ;;  %v930_v2 = vrot.slane %v929_v56, 4  ;;  %v939_v3 = vor.u32 %v938_v57, %v934_v54  ;;  %v846_v4 = vshll.u32 %v2271_v45, 16  ;;  %v2377_v45 = vld [vmem:[%s2749_s21 + $0x4c] sm:$0xf] }
  0x3e   : > { %v832_v8 = vrot.slane %v830_v61, 5  ;;  %v838_v9 = vrot.slane %v836_v62, 5  ;;  %v842_v10 = vrot.slane %v840_v63, 4  ;;  %v2326_v11 = vrot.slane %v2310_v50, 9 }
  0x3f   : > { %1018 = vrot.lane.b32.xlu0 %v2290_v1, %s2690_s25  ;;  %v935_v13 = vsel %vm2805_vm5, %v930_v2, %v934_v54  ;;  %v940_v14 = vrot.slane %v939_v3, 4  ;;  %v848_v15 = vrot.slane %v846_v4, 5  ;;  %v1129_v16 = vrot.slane %v2311_v55, 5  ;;  %v2378_v54 = vld [vmem:[%s2749_s21 + $0x50] sm:$0x1] }
  0x40   : > { %v833_v18 = vor.u32 %v832_v8, %v829_v59  ;;  %v843_v19 = vor.u32 %v842_v10, %v838_v9  ;;  %v1132_v20 = vrot.slane %v2312_v5, 5  ;;  %v2322_v21 = vrot.slane %v2298_v6, 9  ;;  %v2364_v59 = vld [vmem:[%s2749_s21 + $0x18] sm:$0xf]  ;;  %v2365_v1 = vld [vmem:[%s2749_s21 + $0x1c] sm:$0xf] }
  0x41   : > { %v945_v23 = vsel %vm2805_vm5, %v940_v14, %v944_v58  ;;  %v1130_v24 = vsel %vm2751_vm2, %v2326_v11, %v1129_v16  ;;  %v1131_v25 = vrot.slane %v1129_v16, 4  ;;  %v1101_v26 = vrot.slane %v2299_v12, 5  ;;  %v2366_v10 = vld [vmem:[%s2749_s21 + $0x20] sm:$0x1]  ;;  %v2379_v16 = vld [vmem:[%s2749_s21 + $0x54] sm:$0xf] }
  0x42   : > { %v2295_v29 = vcombine.low %v935_v13, %v945_v23  ;;  %v834_v30 = vrot.slane %v833_v18, 4  ;;  %v844_v31 = vrot.slane %v843_v19, 4  ;;  %v1104_v32 = vrot.slane %v2300_v17, 5  ;;  %v2592_v17 = vld [vmem:[%s2749_s21 + $0x48] sm:$0xff]  }
  0x43   : > { %v1133_v34 = vsel %vm2751_vm2, %v1131_v25, %v1132_v20  ;;  %v1102_v35 = vsel %vm2751_vm2, %v2322_v21, %v1101_v26  ;;  %v1103_v36 = vrot.slane %v1101_v26, 4  ;;  %v2327_v37 = vrot.slane %v2313_v22, 9  ;;  %v2380_v22 = vld [vmem:[%s2749_s21 + $0x58] sm:$0xf] }
  0x44   : > { %1028 = vrot.lane.b32.xlu1 %v2295_v29, %s2690_s25  ;;  %v839_v40 = vsel %vm2805_vm5, %v834_v30, %v838_v9  ;;  %v849_v41 = vsel %vm2805_vm5, %v844_v31, %v848_v15  ;;  %v2334_v42 = vcombine.low %v1130_v24, %v1133_v34  ;;  %v1136_v43 = vrot.slane %v2314_v27, 5  ;;  %v2593_v27 = vld [vmem:[%s2749_s21 + $0x18] sm:$0xff]  }
  0x45   : > { %v2291_v46 = vcombine.low %v839_v40, %v849_v41  ;;  %v1105_v47 = vsel %vm2751_vm2, %v1103_v36, %v1104_v32  ;;  %v1139_v48 = vrot.slane %v2315_v28, 5  ;;  %v2323_v49 = vrot.slane %v2301_v33, 9 }
  0x46   : > { %v2330_v50 = vcombine.low %v1102_v35, %v1105_v47  ;;  %v1137_v51 = vsel %vm2751_vm2, %v2327_v37, %v1136_v43  ;;  %v1138_v52 = vrot.slane %v1136_v43, 4  ;;  %v1108_v53 = vrot.slane %v2302_v38, 5  ;;  %v2381_v35 = vld [vmem:[%s2749_s21 + $0x5c] sm:$0x1]  ;;  %v2367_v37 = vld [vmem:[%s2749_s21 + $0x24] sm:$0xf] }
  0x47   : > { %1020 = vrot.lane.b32.xlu0 %v2291_v46, %s2690_s25  ;;  %v1111_v55 = vrot.slane %v2303_v39, 5  ;;  %v1426_v56 = vshrl.u32 %v2376_v44, 16  ;;  %v1429_v57 = vshll.u32 %v2376_v44, 16  ;;  %v1435_v58 = vshll.u32 %v2377_v45, 16  ;;  %v2594_v38 = vld [vmem:[%s2749_s21 + $0x54] sm:$0xff]  }
  0x48   : > { %1187 = vrot.lane.b32.xlu1 %v2334_v42, %s2691_s26  ;;  %v1140_v60 = vsel %vm2751_vm2, %v1138_v52, %v1139_v48  ;;  %v1109_v61 = vsel %vm2751_vm2, %v2323_v49, %v1108_v53  ;;  %v1110_v62 = vrot.slane %v1108_v53, 4  ;;  %v1439_v63 = vshrl.u32 %v2377_v45, 16  ;;  %v2368_v43 = vld [vmem:[%s2749_s21 + $0x28] sm:$0xf]  ;;  %v2369_v48 = vld [vmem:[%s2749_s21 + $0x2c] sm:$0x1] }
  0x49   : > { %v2335_v2 = vcombine.low %v1137_v51, %v1140_v60  ;;  %v1428_v3 = vrot.slane %v1426_v56, 4  ;;  %v1431_v4 = vrot.slane %v1429_v57, 5  ;;  %v1437_v5 = vrot.slane %v1435_v58, 5  ;;  %v2408_v53 = vld [vmem:[%s2749_s21 + $0x48] sm:$0xe] }
  0x4a   : > { %v1112_v6 = vsel %vm2751_vm2, %v1110_v62, %v1111_v55  ;;  %v1441_v8 = vrot.slane %v1439_v63, 4  ;;  %v1445_v9 = vshll.u32 %v2378_v54, 16  ;;  %v1330_v11 = vshrl.u32 %v2364_v59, 16  ;;  %v2595_v54 = vld [vmem:[%s2749_s21 + $0x24] sm:$0xff]  }
  0x4b   : > { %1179 = vrot.lane.b32.xlu0 %v2330_v50, %s2691_s26  ;;  %v2331_v12 = vcombine.low %v1109_v61, %v1112_v6  ;;  %v1432_v13 = vor.u32 %v1431_v4, %v1428_v3  ;;  %v1333_v14 = vshll.u32 %v2364_v59, 16  ;;  %v1339_v15 = vshll.u32 %v2365_v1, 16  ;;  %v2409_v59 = vld [vmem:[%s2749_s21 + $0x4c] sm:$0xf]  ;;  %v2396_v6 = vld [vmem:[%s2749_s21 + $0x18] sm:$0xe] }
  0x4c   : > { %1189 = vrot.lane.b32.xlu1 %v2335_v2, %s2691_s26  ;;  %v1442_v18 = vor.u32 %v1441_v8, %v1437_v5  ;;  %v1447_v19 = vrot.slane %v1445_v9, 5  ;;  %v1332_v20 = vrot.slane %v1330_v11, 4  ;;  %v1343_v21 = vshrl.u32 %v2365_v1, 16  ;;  %v2410_v1 = vld [vmem:[%s2749_s21 + $0x50] sm:$0x1] }
  0x4d   : > { %v1433_v23 = vrot.slane %v1432_v13, 4  ;;  %v1335_v24 = vrot.slane %v1333_v14, 5  ;;  %v1341_v25 = vrot.slane %v1339_v15, 5  ;;  %v1349_v26 = vshll.u32 %v2366_v10, 16  ;;  %v2397_v8 = vld [vmem:[%s2749_s21 + $0x1c] sm:$0xf] }
  0x4e   : > { %v1443_v28 = vrot.slane %v1442_v18, 4  ;;  %v1345_v29 = vrot.slane %v1343_v21, 4  ;;  %v1450_v30 = vshrl.u32 %v2379_v16, 16  ;;  %v1453_v31 = vshll.u32 %v2379_v16, 16 }
  0x4f   : > { %1181 = vrot.lane.b32.xlu0 %v2331_v12, %s2691_s26  ;;  %v1438_v32 = vsel %vm2805_vm5, %v1433_v23, %v1437_v5  ;;  %v1336_v33 = vor.u32 %v1335_v24, %v1332_v20  ;;  %v1351_v34 = vrot.slane %v1349_v26, 5  ;;  %v1459_v36 = vshll.u32 %v2380_v22, 16 }
  0x50   : > { %1280 = vrot.lane.b32.xlu1 %v2592_v17, %s2692_s27  ;;  %v1448_v39 = vsel %vm2805_vm5, %v1443_v28, %v1447_v19  ;;  %v1346_v40 = vor.u32 %v1345_v29, %v1341_v25  ;;  %v1452_v41 = vrot.slane %v1450_v30, 4  ;;  %v1455_v42 = vrot.slane %v1453_v31, 5  ;;  %v2398_v17 = vld [vmem:[%s2749_s21 + $0x20] sm:$0x1] }
  0x51   : > { %v2392_v44 = vcombine.low %v1438_v32, %v1448_v39  ;;  %v1337_v45 = vrot.slane %v1336_v33, 4  ;;  %v1461_v46 = vrot.slane %v1459_v36, 5  ;;  %v1463_v47 = vshrl.u32 %v2380_v22, 16  ;;  %v263_v22 = vld [vmem:[%s2749_s21 + $0x48] sm:$0xf] }
  0x52   : > { %v1347_v49 = vrot.slane %v1346_v40, 4  ;;  %v1456_v50 = vor.u32 %v1455_v42, %v1452_v41  ;;  %v1469_v51 = vshll.u32 %v2381_v35, 16  ;;  %v1354_v52 = vshrl.u32 %v2367_v37, 16  ;;  %v265_v32 = vld [vmem:[%s2749_s21 + $0x50] sm:$0x1] }
  0x53   : > { %1272 = vrot.lane.b32.xlu0 %v2593_v27, %s2692_s27  ;;  %v1342_v55 = vsel %vm2805_vm5, %v1337_v45, %v1341_v25  ;;  %v1465_v56 = vrot.slane %v1463_v47, 4  ;;  %v1357_v57 = vshll.u32 %v2367_v37, 16  ;;  %v1363_v58 = vshll.u32 %v2368_v43, 16  ;;  %v264_v27 = vld [vmem:[%s2749_s21 + $0x4c] sm:$0xf] }
  0x54   : > { %1282 = vrot.lane.b32.xlu1 %v2594_v38, %s2692_s27  ;;  %v1352_v60 = vsel %vm2805_vm5, %v1347_v49, %v1351_v34  ;;  %v1457_v61 = vrot.slane %v1456_v50, 4  ;;  %v1471_v62 = vrot.slane %v1469_v51, 5  ;;  %v1356_v63 = vrot.slane %v1354_v52, 4  ;;  %v251_v37 = vld [vmem:[%s2749_s21 + $0x18] sm:$0xf] }
  0x55   : > { %v2388_v2 = vcombine.low %v1342_v55, %v1352_v60  ;;  %v1466_v3 = vor.u32 %v1465_v56, %v1461_v46  ;;  %v1359_v4 = vrot.slane %v1357_v57, 5  ;;  %v1365_v5 = vrot.slane %v1363_v58, 5  ;;  %v252_v38 = vld [vmem:[%s2749_s21 + $0x1c] sm:$0xf]  ;;  %v2610_v60 = vld [vmem:[%s3421_s1] sm:$0xff]  }
  0x56   : > { %v1462_v9 = vsel %vm2805_vm5, %v1457_v61, %v1461_v46  ;;  %v1367_v10 = vshrl.u32 %v2368_v43, 16  ;;  %v1373_v11 = vshll.u32 %v2369_v48, 16  ;;  %v2424_v12 = vrot.slane %v2408_v53, 9  ;;  %v253_v43 = vld [vmem:[%s2749_s21 + $0x20] sm:$0x1]  ;;  %2509 = vmatprep.subr.bf16.mxu0 %v2610_v60  ;;  %2531 = vmatprep.subr.bf16.mxu1 %v2610_v60 }
  0x57   : > { %1274 = vrot.lane.b32.xlu0 %v2595_v54, %s2692_s27  ;;  %v1467_v13 = vrot.slane %v1466_v3, 4  ;;  %v1360_v14 = vor.u32 %v1359_v4, %v1356_v63  ;;  %v1656_v15 = vrot.slane %v2409_v59, 5  ;;  %v1659_v16 = vrot.slane %v2410_v1, 5  ;;  %v2411_v48 = vld [vmem:[%s2749_s21 + $0x54] sm:$0xe]  ;;  %2510 = vmatpush3.bf16.msra.mxu0 %v2610_v60 }
  0x58   : > { %1553 = vrot.lane.b32.xlu1 %v2392_v44, %s2693_s28  ;;  %v1369_v18 = vrot.slane %v1367_v10, 4  ;;  %v1375_v19 = vrot.slane %v1373_v11, 5  ;;  %v2420_v20 = vrot.slane %v2396_v6, 9  ;;  %v1628_v21 = vrot.slane %v2397_v8, 5  ;;  %v2412_v53 = vld [vmem:[%s2749_s21 + $0x58] sm:$0xf]  ;;  %2534 = vmatpush3.bf16.msra.mxu1 %v2610_v60 }
  0x59   : > { %v1472_v23 = vsel %vm2805_vm5, %v1467_v13, %v1471_v62  ;;  %v1361_v24 = vrot.slane %v1360_v14, 4  ;;  %v1657_v25 = vsel %vm2751_vm2, %v2424_v12, %v1656_v15  ;;  %v1658_v26 = vrot.slane %v1656_v15, 4  ;;  %v2413_v54 = vld [vmem:[%s2749_s21 + $0x5c] sm:$0x1]  ;;  %v2399_v59 = vld [vmem:[%s2749_s21 + $0x24] sm:$0xe] }
  0x5a   : > { %v2393_v28 = vcombine.low %v1462_v9, %v1472_v23  ;;  %v1370_v29 = vor.u32 %v1369_v18, %v1365_v5  ;;  %v2942_v30 = vsel %vm2751_vm2, %v2420_v20, %v1628_v21  ;;  %v1630_v31 = vrot.slane %v1628_v21, 4  ;;  %v2401_v8 = vld [vmem:[%s2749_s21 + $0x2c] sm:$0x1]  ;;  %v266_v21 = vld [vmem:[%s2749_s21 + $0x54] sm:$0xf] }
  0x5b   : > { %1545 = vrot.lane.b32.xlu0 %v2388_v2, %s2693_s28  ;;  %v1366_v33 = vsel %vm2805_vm5, %v1361_v24, %v1365_v5  ;;  %v1660_v34 = vsel %vm2751_vm2, %v1658_v26, %v1659_v16  ;;  %v1631_v35 = vrot.slane %v2398_v17, 5  ;;  %v417_v36 = vshrl.u32 %v263_v22, 16  ;;  %v2400_v2 = vld [vmem:[%s2749_s21 + $0x28] sm:$0xf] }
  0x5c   : > { %1555 = vrot.lane.b32.xlu1 %v2393_v28, %s2693_s28  ;;  %v1371_v39 = vrot.slane %v1370_v29, 4  ;;  %v2432_v40 = vcombine.low %v1657_v25, %v1660_v34  ;;  %v420_v41 = vshll.u32 %v263_v22, 16  ;;  %v426_v42 = vshll.u32 %v264_v27, 16  ;;  %v2611_v22 = vld [vmem:[%s3421_s1 + $0x8] sm:$0xff]  }
  0x5d   : > { %v1632_v44 = vsel %vm2751_vm2, %v1630_v31, %v1631_v35  ;;  %v419_v45 = vrot.slane %v417_v36, 4  ;;  %v430_v46 = vshrl.u32 %v264_v27, 16  ;;  %v436_v47 = vshll.u32 %v265_v32, 16  ;;  %v267_v31 = vld [vmem:[%s2749_s21 + $0x58] sm:$0xf]  ;;  %2511 = vmatprep.subr.bf16.mxu0 %v2611_v22  ;;  %2532 = vmatprep.subr.bf16.mxu1 %v2611_v22 }
  0x5e   : > { %v1376_v49 = vsel %vm2805_vm5, %v1371_v39, %v1375_v19  ;;  %v2428_v50 = vcombine.low %v2942_v30, %v1632_v44  ;;  %v422_v51 = vrot.slane %v420_v41, 5  ;;  %v428_v52 = vrot.slane %v426_v42, 5  ;;  %v268_v35 = vld [vmem:[%s2749_s21 + $0x5c] sm:$0x1]  ;;  %2512 = vmatpush3.bf16.msra.mxu0 %v2611_v22  ;;  %2535 = vmatpush3.bf16.msra.mxu1 %v2611_v22  ;;  %v254_v41 = vld [vmem:[%s2749_s21 + $0x24] sm:$0xf] }
  0x5f   : > { %v2389_v55 = vcombine.low %v1366_v33, %v1376_v49  ;;  %v432_v56 = vrot.slane %v430_v46, 4  ;;  %v438_v57 = vrot.slane %v436_v47, 5  ;;  %v321_v58 = vshrl.u32 %v251_v37, 16  ;;  %v255_v42 = vld [vmem:[%s2749_s21 + $0x28] sm:$0xf] }
  0x60   : > { %1714 = vrot.lane.b32.xlu1 %v2432_v40, %s2694_s3  ;;  %v423_v61 = vor.u32 %v422_v51, %v419_v45  ;;  %v324_v62 = vshll.u32 %v251_v37, 16  ;;  %v330_v63 = vshll.u32 %v252_v38, 16  ;;  %v334_v1 = vshrl.u32 %v252_v38, 16  ;;  %v256_v47 = vld [vmem:[%s2749_s21 + $0x2c] sm:$0x1] }
  0x61   : > { %1547 = vrot.lane.b32.xlu0 %v2389_v55, %s2693_s28  ;;  %v433_v3 = vor.u32 %v432_v56, %v428_v52  ;;  %v323_v4 = vrot.slane %v321_v58, 4  ;;  %v340_v5 = vshll.u32 %v253_v43, 16  ;;  %v2425_v6 = vrot.slane %v2411_v48, 9  ;;  %v539_v48 = vld [vmem:[%s2749_s21 + $0x48] sm:$0xe] }
  0x62   : > { %v424_v9 = vrot.slane %v423_v61, 4  ;;  %v326_v10 = vrot.slane %v324_v62, 5  ;;  %v332_v11 = vrot.slane %v330_v63, 5  ;;  %v336_v12 = vrot.slane %v334_v1, 4  ;;  %v541_v58 = vld [vmem:[%s2749_s21 + $0x50] sm:$0x1] }
  0x63   : > { %v434_v13 = vrot.slane %v433_v3, 4  ;;  %v342_v14 = vrot.slane %v340_v5, 5  ;;  %v1663_v15 = vrot.slane %v2412_v53, 5  ;;  %v1666_v16 = vrot.slane %v2413_v54, 5  ;;  %v540_v53 = vld [vmem:[%s2749_s21 + $0x4c] sm:$0xf] }
  0x64   : > { %v429_v17 = vsel %vm2805_vm5, %v424_v9, %v428_v52  ;;  %v327_v18 = vor.u32 %v326_v10, %v323_v4  ;;  %v337_v19 = vor.u32 %v336_v12, %v332_v11  ;;  %v2421_v20 = vrot.slane %v2399_v59, 9  ;;  %v527_v63 = vld [vmem:[%s2749_s21 + $0x18] sm:$0xe]  ;;  %v528_v5 = vld [vmem:[%s2749_s21 + $0x1c] sm:$0xf] }
  0x65   : > { %1706 = vrot.lane.b32.xlu0 %v2428_v50, %s2694_s3  ;;  %v439_v23 = vsel %vm2805_vm5, %v434_v13, %v438_v57  ;;  %v1664_v24 = vsel %vm2751_vm2, %v2425_v6, %v1663_v15  ;;  %v1665_v25 = vrot.slane %v1663_v15, 4  ;;  %v1635_v26 = vrot.slane %v2400_v2, 5  ;;  %v544_v22 = vld [vmem:[%s2749_s21 + $0x5c] sm:$0x1] }
  0x66   : > { %v2222_v27 = vcombine.low %v429_v17, %v439_v23  ;;  %v328_v28 = vrot.slane %v327_v18, 4  ;;  %v338_v29 = vrot.slane %v337_v19, 4  ;;  %v1638_v30 = vrot.slane %v2401_v8, 5 }
  0x67   : > { %v1667_v32 = vsel %vm2751_vm2, %v1665_v25, %v1666_v16  ;;  %v1636_v33 = vsel %vm2751_vm2, %v2421_v20, %v1635_v26  ;;  %v1637_v34 = vrot.slane %v1635_v26, 4  ;;  %v441_v36 = vshrl.u32 %v266_v21, 16  ;;  %v542_v16 = vld [vmem:[%s2749_s21 + $0x54] sm:$0xe] }
  0x68   : > { %500 = vrot.lane.b32.xlu1 %v2222_v27, %s2689_s24  ;;  %v333_v37 = vsel %vm2805_vm5, %v328_v28, %v332_v11  ;;  %v343_v38 = vsel %vm2805_vm5, %v338_v29, %v342_v14  ;;  %v2433_v39 = vcombine.low %v1664_v24, %v1667_v32  ;;  %v444_v40 = vshll.u32 %v266_v21, 16  ;;  %v529_v11 = vld [vmem:[%s2749_s21 + $0x20] sm:$0x1]  ;;  %v543_v21 = vld [vmem:[%s2749_s21 + $0x58] sm:$0xf] }
  0x69   : > { %v2218_v43 = vcombine.low %v333_v37, %v343_v38  ;;  %v1639_v44 = vsel %vm2751_vm2, %v1637_v34, %v1638_v30  ;;  %v443_v45 = vrot.slane %v441_v36, 4  ;;  %v450_v46 = vshll.u32 %v267_v31, 16  ;;  %v530_v27 = vld [vmem:[%s2749_s21 + $0x24] sm:$0xe]  ;;  %v531_v32 = vld [vmem:[%s2749_s21 + $0x28] sm:$0xf] }
  0x6a   : > { %v2429_v49 = vcombine.low %v1636_v33, %v1639_v44  ;;  %v446_v50 = vrot.slane %v444_v40, 5  ;;  %v454_v51 = vshrl.u32 %v267_v31, 16  ;;  %v460_v52 = vshll.u32 %v268_v35, 16  ;;  %v532_v37 = vld [vmem:[%s2749_s21 + $0x2c] sm:$0x1] }
  0x6b   : > { %492 = vrot.lane.b32.xlu0 %v2218_v43, %s2689_s24  ;;  %v452_v54 = vrot.slane %v450_v46, 5  ;;  %v345_v55 = vshrl.u32 %v254_v41, 16  ;;  %v348_v56 = vshll.u32 %v254_v41, 16  ;;  %v354_v57 = vshll.u32 %v255_v42, 16  ;;  %v2284_v38 = vld [vmem:[%s2749_s21 + $0x54] sm:$0xf] }
  0x6c   : > { %1716 = vrot.lane.b32.xlu1 %v2433_v39, %s2694_s3  ;;  %v447_v59 = vor.u32 %v446_v50, %v443_v45  ;;  %v456_v60 = vrot.slane %v454_v51, 4  ;;  %v462_v61 = vrot.slane %v460_v52, 5  ;;  %v358_v62 = vshrl.u32 %v255_v42, 16  ;;  %v2285_v39 = vld [vmem:[%s2749_s21 + $0x58] sm:$0xf] }
  0x6d   : > { %v347_v1 = vrot.slane %v345_v55, 4  ;;  %v350_v2 = vrot.slane %v348_v56, 5  ;;  %v356_v3 = vrot.slane %v354_v57, 5  ;;  %v364_v4 = vshll.u32 %v256_v47, 16  ;;  %v2286_v44 = vld [vmem:[%s2749_s21 + $0x5c] sm:$0x1] }
  0x6e   : > { %v448_v6 = vrot.slane %v447_v59, 4  ;;  %v457_v8 = vor.u32 %v456_v60, %v452_v54  ;;  %v360_v9 = vrot.slane %v358_v62, 4  ;;  %v2230_v10 = vrot.slane %v539_v48, 9 }
  0x6f   : > { %1708 = vrot.lane.b32.xlu0 %v2429_v49, %s2694_s3  ;;  %v351_v12 = vor.u32 %v350_v2, %v347_v1  ;;  %v366_v13 = vrot.slane %v364_v4, 5  ;;  %v616_v14 = vrot.slane %v540_v53, 5  ;;  %v619_v15 = vrot.slane %v541_v58, 5  ;;  %v2272_v53 = vld [vmem:[%s2749_s21 + $0x24] sm:$0xf] }
  0x70   : > { %v453_v17 = vsel %vm2805_vm5, %v448_v6, %v452_v54  ;;  %v458_v18 = vrot.slane %v457_v8, 4  ;;  %v361_v19 = vor.u32 %v360_v9, %v356_v3  ;;  %v2226_v20 = vrot.slane %v527_v63, 9  ;;  %v2273_v54 = vld [vmem:[%s2749_s21 + $0x28] sm:$0xf]  ;;  %v2274_v4 = vld [vmem:[%s2749_s21 + $0x2c] sm:$0x1] }
  0x71   : > { %v352_v23 = vrot.slane %v351_v12, 4  ;;  %v617_v24 = vsel %vm2751_vm2, %v2230_v10, %v616_v14  ;;  %v618_v25 = vrot.slane %v616_v14, 4  ;;  %v588_v26 = vrot.slane %v528_v5, 5  ;;  %v2287_v10 = vld [vmem:[%s2749_s21 + $0x60] sm:$0xf] }
  0x72   : > { %v463_v28 = vsel %vm2805_vm5, %v458_v18, %v462_v61  ;;  %v362_v29 = vrot.slane %v361_v19, 4  ;;  %v591_v30 = vrot.slane %v529_v11, 5  ;;  %v2231_v31 = vrot.slane %v542_v16, 9  ;;  %v2288_v19 = vld [vmem:[%s2749_s21 + $0x64] sm:$0xf] }
  0x73   : > { %v2223_v33 = vcombine.low %v453_v17, %v463_v28  ;;  %v357_v34 = vsel %vm2805_vm5, %v352_v23, %v356_v3  ;;  %v620_v35 = vsel %vm2751_vm2, %v618_v25, %v619_v15  ;;  %v589_v36 = vsel %vm2751_vm2, %v2226_v20, %v588_v26  ;;  %v2596_v20 = vld [vmem:[%s2749_s21 + $0x54] sm:$0xff]  }
  0x74   : > { %v367_v40 = vsel %vm2805_vm5, %v362_v29, %v366_v13  ;;  %v2238_v41 = vcombine.low %v617_v24, %v620_v35  ;;  %v590_v42 = vrot.slane %v588_v26, 4  ;;  %v623_v43 = vrot.slane %v543_v21, 5  ;;  %v2289_v29 = vld [vmem:[%s2749_s21 + $0x68] sm:$0x1]  ;;  %v2275_v35 = vld [vmem:[%s2749_s21 + $0x30] sm:$0xf] }
  0x75   : > { %502 = vrot.lane.b32.xlu1 %v2223_v33, %s2689_s24  ;;  %v2219_v45 = vcombine.low %v357_v34, %v367_v40  ;;  %v626_v46 = vrot.slane %v544_v22, 5  ;;  %v2227_v47 = vrot.slane %v530_v27, 9  ;;  %v595_v48 = vrot.slane %v531_v32, 5  ;;  %v2276_v40 = vld [vmem:[%s2749_s21 + $0x34] sm:$0xf] }
  0x76   : > { %v592_v49 = vsel %vm2751_vm2, %v590_v42, %v591_v30  ;;  %v624_v50 = vsel %vm2751_vm2, %v2231_v31, %v623_v43  ;;  %v625_v51 = vrot.slane %v623_v43, 4  ;;  %v598_v52 = vrot.slane %v532_v37, 5  ;;  %v2597_v30 = vld [vmem:[%s2749_s21 + $0x24] sm:$0xff]   ;;  %v2599_v42 = vld [vmem:[%s2749_s21 + $0x30] sm:$0xff]  }
  0x77   : > { %494 = vrot.lane.b32.xlu0 %v2219_v45, %s2689_s24  ;;  %v2234_v55 = vcombine.low %v589_v36, %v592_v49  ;;  %v596_v56 = vsel %vm2751_vm2, %v2227_v47, %v595_v48  ;;  %v597_v57 = vrot.slane %v595_v48, 4  ;;  %v947_v58 = vshrl.u32 %v2284_v38, 16 }
  0x78   : > { %v627_v59 = vsel %vm2751_vm2, %v625_v51, %v626_v46  ;;  %v950_v60 = vshll.u32 %v2284_v38, 16  ;;  %v956_v61 = vshll.u32 %v2285_v39, 16  ;;  %v960_v62 = vshrl.u32 %v2285_v39, 16 }
  0x79   : > { %664 = vrot.lane.b32.xlu1 %v2238_v41, %s2688_s23  ;;  %v2239_v63 = vcombine.low %v624_v50, %v627_v59  ;;  %v599_v1 = vsel %vm2751_vm2, %v597_v57, %v598_v52  ;;  %v949_v2 = vrot.slane %v947_v58, 4  ;;  %v966_v3 = vshll.u32 %v2286_v44, 16  ;;  %v2598_v41 = vld [vmem:[%s2749_s21 + $0x60] sm:$0xff]   ;;  %v2277_v50 = vld [vmem:[%s2749_s21 + $0x38] sm:$0x1] }
  0x7a   : > { %v2235_v5 = vcombine.low %v596_v56, %v599_v1  ;;  %v952_v6 = vrot.slane %v950_v60, 5  ;;  %v958_v8 = vrot.slane %v956_v61, 5  ;;  %v962_v9 = vrot.slane %v960_v62, 4  ;;  %v2316_v56 = vld [vmem:[%s2749_s21 + $0x54] sm:$0xe] }
  0x7b   : > { %656 = vrot.lane.b32.xlu0 %v2234_v55, %s2688_s23  ;;  %v968_v11 = vrot.slane %v966_v3, 5  ;;  %v851_v12 = vshrl.u32 %v2272_v53, 16  ;;  %v854_v13 = vshll.u32 %v2272_v53, 16  ;;  %v860_v14 = vshll.u32 %v2273_v54, 16  ;;  %v2317_v57 = vld [vmem:[%s2749_s21 + $0x58] sm:$0xf] }
  0x7c   : > { %v953_v15 = vor.u32 %v952_v6, %v949_v2  ;;  %v963_v16 = vor.u32 %v962_v9, %v958_v8  ;;  %v864_v17 = vshrl.u32 %v2273_v54, 16  ;;  %v870_v18 = vshll.u32 %v2274_v4, 16  ;;  %v2318_v62 = vld [vmem:[%s2749_s21 + $0x5c] sm:$0x1]  ;;  %v2306_v6 = vld [vmem:[%s2749_s21 + $0x2c] sm:$0x1] }
  0x7d   : > { %666 = vrot.lane.b32.xlu1 %v2239_v63, %s2688_s23  ;;  %v853_v21 = vrot.slane %v851_v12, 4  ;;  %v856_v22 = vrot.slane %v854_v13, 5  ;;  %v862_v23 = vrot.slane %v860_v14, 5  ;;  %v971_v24 = vshrl.u32 %v2287_v10, 16  ;;  %v2304_v63 = vld [vmem:[%s2749_s21 + $0x24] sm:$0xe] }
  0x7e   : > { %v954_v25 = vrot.slane %v953_v15, 4  ;;  %v964_v26 = vrot.slane %v963_v16, 4  ;;  %v866_v27 = vrot.slane %v864_v17, 4  ;;  %v872_v28 = vrot.slane %v870_v18, 5  ;;  %v2319_v12 = vld [vmem:[%s2749_s21 + $0x60] sm:$0xe] }
  0x7f   : > { %658 = vrot.lane.b32.xlu0 %v2235_v5, %s2688_s23  ;;  %v857_v31 = vor.u32 %v856_v22, %v853_v21  ;;  %v973_v32 = vrot.slane %v971_v24, 4  ;;  %v974_v33 = vshll.u32 %v2287_v10, 16  ;;  %v980_v34 = vshll.u32 %v2288_v19, 16  ;;  %v2305_v5 = vld [vmem:[%s2749_s21 + $0x28] sm:$0xf] }
  0x80   : > { %v959_v36 = vsel %vm2805_vm5, %v954_v25, %v958_v8  ;;  %v969_v37 = vsel %vm2805_vm5, %v964_v26, %v968_v11  ;;  %v867_v38 = vor.u32 %v866_v27, %v862_v23  ;;  %v984_v39 = vshrl.u32 %v2288_v19, 16  ;;  %v2320_v17 = vld [vmem:[%s2749_s21 + $0x64] sm:$0xf]  ;;  %v2321_v18 = vld [vmem:[%s2749_s21 + $0x68] sm:$0x1] }
  0x81   : > { %757 = vrot.lane.b32.xlu1 %v2596_v20, %s2687_s22  ;;  %v2296_v43 = vcombine.low %v959_v36, %v969_v37  ;;  %v858_v44 = vrot.slane %v857_v31, 4  ;;  %v976_v45 = vrot.slane %v974_v33, 5  ;;  %v982_v46 = vrot.slane %v980_v34, 5 }
  0x82   : > { %v868_v47 = vrot.slane %v867_v38, 4  ;;  %v986_v48 = vrot.slane %v984_v39, 4  ;;  %v990_v49 = vshll.u32 %v2289_v29, 16  ;;  %v875_v51 = vshrl.u32 %v2275_v35, 16  ;;  %v2308_v29 = vld [vmem:[%s2749_s21 + $0x34] sm:$0xf] }
  0x83   : > { %749 = vrot.lane.b32.xlu0 %v2597_v30, %s2687_s22  ;;  %v863_v52 = vsel %vm2805_vm5, %v858_v44, %v862_v23  ;;  %v977_v53 = vor.u32 %v976_v45, %v973_v32  ;;  %v878_v54 = vshll.u32 %v2275_v35, 16  ;;  %v884_v55 = vshll.u32 %v2276_v40, 16  ;;  %v2307_v23 = vld [vmem:[%s2749_s21 + $0x30] sm:$0xe]  ;;  %v2309_v30 = vld [vmem:[%s2749_s21 + $0x38] sm:$0x1] }
  0x84   : > { %v873_v58 = vsel %vm2805_vm5, %v868_v47, %v872_v28  ;;  %v987_v59 = vor.u32 %v986_v48, %v982_v46  ;;  %v992_v60 = vrot.slane %v990_v49, 5  ;;  %v877_v61 = vrot.slane %v875_v51, 4  ;;  %v2382_v35 = vld [vmem:[%s2749_s21 + $0x60] sm:$0xf]  ;;  %v2383_v44 = vld [vmem:[%s2749_s21 + $0x64] sm:$0xf] }
  0x85   : > { %759 = vrot.lane.b32.xlu1 %v2598_v41, %s2687_s22  ;;  %v2292_v1 = vcombine.low %v863_v52, %v873_v58  ;;  %v978_v2 = vrot.slane %v977_v53, 4  ;;  %v880_v3 = vrot.slane %v878_v54, 5  ;;  %v886_v4 = vrot.slane %v884_v55, 5  ;;  %v2384_v45 = vld [vmem:[%s2749_s21 + $0x68] sm:$0x1] }
  0x86   : > { %v988_v8 = vrot.slane %v987_v59, 4  ;;  %v888_v9 = vshrl.u32 %v2276_v40, 16  ;;  %v894_v10 = vshll.u32 %v2277_v50, 16  ;;  %v2328_v11 = vrot.slane %v2316_v56, 9  ;;  %v2371_v52 = vld [vmem:[%s2749_s21 + $0x34] sm:$0xf] }
  0x87   : > { %751 = vrot.lane.b32.xlu0 %v2599_v42, %s2687_s22  ;;  %v983_v13 = vsel %vm2805_vm5, %v978_v2, %v982_v46  ;;  %v881_v14 = vor.u32 %v880_v3, %v877_v61  ;;  %v1143_v15 = vrot.slane %v2317_v57, 5  ;;  %v1146_v16 = vrot.slane %v2318_v62, 5  ;;  %v2370_v46 = vld [vmem:[%s2749_s21 + $0x30] sm:$0xf]  ;;  %v2372_v3 = vld [vmem:[%s2749_s21 + $0x38] sm:$0x1] }
  0x88   : > { %v993_v19 = vsel %vm2805_vm5, %v988_v8, %v992_v60  ;;  %v890_v20 = vrot.slane %v888_v9, 4  ;;  %v896_v21 = vrot.slane %v894_v10, 5  ;;  %v2324_v22 = vrot.slane %v2304_v63, 9  ;;  %v3084_v24 = vpop.permute.xlu1 %753  ;;  %v3102_v47 = vpop.permute.xlu0 %745  ;;  %v2386_v10 = vld [vmem:[%s2749_s21 + $0x70] sm:$0xf] }
  0x89   : > { %1030 = vrot.lane.b32.xlu1 %v2296_v43, %s2690_s25  ;;  %v2297_v25 = vcombine.low %v983_v13, %v993_v19  ;;  %v882_v26 = vrot.slane %v881_v14, 4  ;;  %v1144_v27 = vsel %vm2751_vm2, %v2328_v11, %v1143_v15  ;;  %v1145_v28 = vrot.slane %v1143_v15, 4 }
  0x8a   : > { %v891_v31 = vor.u32 %v890_v20, %v886_v4  ;;  %v1115_v32 = vrot.slane %v2305_v5, 5  ;;  %v1118_v33 = vrot.slane %v2306_v6, 5  ;;  %v2329_v34 = vrot.slane %v2319_v12, 9 }
  0x8b   : > { %1022 = vrot.lane.b32.xlu0 %v2292_v1, %s2690_s25  ;;  %v887_v36 = vsel %vm2805_vm5, %v882_v26, %v886_v4  ;;  %v1147_v37 = vsel %vm2751_vm2, %v1145_v28, %v1146_v16  ;;  %v1150_v38 = vrot.slane %v2320_v17, 5  ;;  %v1153_v39 = vrot.slane %v2321_v18, 5  ;;  %v2385_v4 = vld [vmem:[%s2749_s21 + $0x6c] sm:$0xf]  ;;  %v2600_v26 = vld [vmem:[%s2749_s21 + $0x60] sm:$0xff]  }
  0x8c   : > { %v892_v40 = vrot.slane %v891_v31, 4  ;;  %v2336_v41 = vcombine.low %v1144_v27, %v1147_v37  ;;  %v1116_v42 = vsel %vm2751_vm2, %v2324_v22, %v1115_v32  ;;  %v1117_v43 = vrot.slane %v1115_v32, 4  ;;  %v3112_v57 = vpop.permute.xlu1 %755  ;;  %v3125_v15 = vpop.permute.xlu0 %747 }
  0x8d   : > { %1032 = vrot.lane.b32.xlu1 %v2297_v25, %s2690_s25  ;;  %v1151_v48 = vsel %vm2751_vm2, %v2329_v34, %v1150_v38  ;;  %v1152_v49 = vrot.slane %v1150_v38, 4  ;;  %v2325_v50 = vrot.slane %v2307_v23, 9  ;;  %v1122_v51 = vrot.slane %v2308_v29, 5 }
  0x8e   : > { %v897_v53 = vsel %vm2805_vm5, %v892_v40, %v896_v21  ;;  %v1119_v54 = vsel %vm2751_vm2, %v1117_v43, %v1118_v33  ;;  %v1125_v55 = vrot.slane %v2309_v30, 5  ;;  %v1474_v56 = vshrl.u32 %v2382_v35, 16  ;;  %v2387_v33 = vld [vmem:[%s2749_s21 + $0x74] sm:$0x1]  ;;  %v2373_v40 = vld [vmem:[%s2749_s21 + $0x3c] sm:$0xf] }
  0x8f   : > { %v2293_v58 = vcombine.low %v887_v36, %v897_v53  ;;  %v2332_v59 = vcombine.low %v1116_v42, %v1119_v54  ;;  %v1154_v60 = vsel %vm2751_vm2, %v1152_v49, %v1153_v39  ;;  %v1123_v61 = vsel %vm2751_vm2, %v2325_v50, %v1122_v51  ;;  %v2374_v53 = vld [vmem:[%s2749_s21 + $0x40] sm:$0xf] }
  0x90   : > { %v2337_v62 = vcombine.low %v1151_v48, %v1154_v60  ;;  %v1124_v63 = vrot.slane %v1122_v51, 4  ;;  %v1476_v1 = vrot.slane %v1474_v56, 4  ;;  %v1477_v2 = vshll.u32 %v2382_v35, 16  ;;  %v3127_v25 = vpop.permute.xlu1 %660  ;;  %v2602_v48 = vld [vmem:[%s2749_s21 + $0x6c] sm:$0xff]  }
  0x91   : > { %1024 = vrot.lane.b32.xlu0 %v2293_v58, %s2690_s25  ;;  %1191 = vrot.lane.b32.xlu1 %v2336_v41, %s2691_s26  ;;  %v1483_v5 = vshll.u32 %v2383_v44, 16  ;;  %v1487_v6 = vshrl.u32 %v2383_v44, 16  ;;  %v1493_v8 = vshll.u32 %v2384_v45, 16  ;;  %v1378_v9 = vshrl.u32 %v2370_v46, 16  ;;  %v2601_v41 = vld [vmem:[%s2749_s21 + $0x30] sm:$0xff]  }
  0x92   : > { %v1126_v11 = vsel %vm2751_vm2, %v1124_v63, %v1125_v55  ;;  %v1479_v12 = vrot.slane %v1477_v2, 5  ;;  %v1381_v13 = vshll.u32 %v2370_v46, 16  ;;  %v1387_v14 = vshll.u32 %v2371_v52, 16  ;;  %v3137_v46 = vpop.permute.xlu0 %652  ;;  %v2375_v58 = vld [vmem:[%s2749_s21 + $0x44] sm:$0x1] }
  0x93   : > { %v2333_v16 = vcombine.low %v1123_v61, %v1126_v11  ;;  %v1485_v17 = vrot.slane %v1483_v5, 5  ;;  %v1489_v18 = vrot.slane %v1487_v6, 4  ;;  %v1495_v19 = vrot.slane %v1493_v8, 5  ;;  %v2603_v61 = vld [vmem:[%s2749_s21 + $0x3c] sm:$0xff]  }
  0x94   : > { %v1480_v20 = vor.u32 %v1479_v12, %v1476_v1  ;;  %v1380_v21 = vrot.slane %v1378_v9, 4  ;;  %v1383_v22 = vrot.slane %v1381_v13, 5  ;;  %v1389_v23 = vrot.slane %v1387_v14, 5  ;;  %v3148_v60 = vpop.permute.xlu1 %662  ;;  %v2415_v9 = vld [vmem:[%s2749_s21 + $0x64] sm:$0xf] }
  0x95   : > { %1183 = vrot.lane.b32.xlu0 %v2332_v59, %s2691_s26  ;;  %1193 = vrot.lane.b32.xlu1 %v2337_v62, %s2691_s26  ;;  %v1490_v27 = vor.u32 %v1489_v18, %v1485_v17  ;;  %v1391_v28 = vshrl.u32 %v2371_v52, 16  ;;  %v1397_v29 = vshll.u32 %v2372_v3, 16  ;;  %v1498_v30 = vshrl.u32 %v2385_v4, 16  ;;  %v2414_v3 = vld [vmem:[%s2749_s21 + $0x60] sm:$0xe] }
  0x96   : > { %v1481_v31 = vrot.slane %v1480_v20, 4  ;;  %v1384_v32 = vor.u32 %v1383_v22, %v1380_v21  ;;  %v1501_v34 = vshll.u32 %v2385_v4, 16  ;;  %v1507_v35 = vshll.u32 %v2386_v10, 16  ;;  %v2416_v14 = vld [vmem:[%s2749_s21 + $0x68] sm:$0x1] }
  0x97   : > { %v1491_v36 = vrot.slane %v1490_v27, 4  ;;  %v1393_v37 = vrot.slane %v1391_v28, 4  ;;  %v1399_v38 = vrot.slane %v1397_v29, 5  ;;  %v1500_v39 = vrot.slane %v1498_v30, 4  ;;  %v2403_v21 = vld [vmem:[%s2749_s21 + $0x34] sm:$0xf] }
  0x98   : > { %v1486_v42 = vsel %vm2805_vm5, %v1481_v31, %v1485_v17  ;;  %v1385_v43 = vrot.slane %v1384_v32, 4  ;;  %v1503_v44 = vrot.slane %v1501_v34, 5  ;;  %v1509_v45 = vrot.slane %v1507_v35, 5  ;;  %v2404_v22 = vld [vmem:[%s2749_s21 + $0x38] sm:$0x1] }
  0x99   : > { %1185 = vrot.lane.b32.xlu0 %v2333_v16, %s2691_s26  ;;  %1284 = vrot.lane.b32.xlu1 %v2600_v26, %s2692_s27  ;;  %v1496_v49 = vsel %vm2805_vm5, %v1491_v36, %v1495_v19  ;;  %v1394_v50 = vor.u32 %v1393_v37, %v1389_v23  ;;  %v1511_v51 = vshrl.u32 %v2386_v10, 16  ;;  %v1517_v52 = vshll.u32 %v2387_v33, 16  ;;  %v2402_v16 = vld [vmem:[%s2749_s21 + $0x30] sm:$0xe]  ;;  %v2417_v30 = vld [vmem:[%s2749_s21 + $0x6c] sm:$0xe] }
  0x9a   : > { %v2394_v54 = vcombine.low %v1486_v42, %v1496_v49  ;;  %v1390_v55 = vsel %vm2805_vm5, %v1385_v43, %v1389_v23  ;;  %v1504_v56 = vor.u32 %v1503_v44, %v1500_v39  ;;  %v1402_v59 = vshrl.u32 %v2373_v40, 16  ;;  %v3163_v23 = vpop.permute.xlu0 %654  ;;  %v2418_v35 = vld [vmem:[%s2749_s21 + $0x70] sm:$0xf]  ;;  %v2605_v49 = vld [vmem:[%s2749_s21] sm:$0xff]  }
  0x9b   : > { %v1395_v62 = vrot.slane %v1394_v50, 4  ;;  %v1513_v63 = vrot.slane %v1511_v51, 4  ;;  %v1519_v1 = vrot.slane %v1517_v52, 5  ;;  %v1405_v2 = vshll.u32 %v2373_v40, 16  ;;  %v2606_v50 = vld [vmem:[%s2749_s21 + $0x3c] sm:$0xff]   ;;  %v2607_v51 = vld [vmem:[%s2749_s21 + $0x30] sm:$0xff]  }
  0x9c   : > { %v1505_v4 = vrot.slane %v1504_v56, 4  ;;  %v1404_v5 = vrot.slane %v1402_v59, 4  ;;  %v1411_v6 = vshll.u32 %v2374_v53, 16  ;;  %v1415_v8 = vshrl.u32 %v2374_v53, 16  ;;  %v491_v36 = vpop.permute.xlu1 %490  ;;  %v2608_v52 = vld [vmem:[%s2749_s21 + $0x48] sm:$0xff]   ;;  %v2609_v53 = vld [vmem:[%s2749_s21 + $0x18] sm:$0xff]  }
  0x9d   : > { %1276 = vrot.lane.b32.xlu0 %v2601_v41, %s2692_s27  ;;  %1286 = vrot.lane.b32.xlu1 %v2602_v48, %s2692_s27  ;;  %v1400_v10 = vsel %vm2805_vm5, %v1395_v62, %v1399_v38  ;;  %v1514_v11 = vor.u32 %v1513_v63, %v1509_v45  ;;  %v1407_v12 = vrot.slane %v1405_v2, 5  ;;  %v1421_v13 = vshll.u32 %v2375_v58, 16  ;;  %v2419_v41 = vld [vmem:[%s2749_s21 + $0x74] sm:$0x1]  ;;  %v2604_v48 = vld [vmem:[%s2749_s21 + $0xc] sm:$0xff]   ;;  %237 = vst.msk [vmem:[#allocation2] sm:$0xff] %vm236_vm6, %v2605_v49 }
  0x9e   : > { %v2390_v17 = vcombine.low %v1390_v55, %v1400_v10  ;;  %v1510_v18 = vsel %vm2805_vm5, %v1505_v4, %v1509_v45  ;;  %v1413_v19 = vrot.slane %v1411_v6, 5  ;;  %v1417_v20 = vrot.slane %v1415_v8, 4  ;;  %v2405_v59 = vld [vmem:[%s2749_s21 + $0x3c] sm:$0xe]  ;;  %v2613_v6 = vld [vmem:[%s2749_s21 + $0x24] sm:$0xff]   ;;  %238 = vst.msk [vmem:[#allocation2 + $0x8] sm:$0xff] %vm236_vm6, %v2604_v48 }
  0x9f   : > { %v1515_v26 = vrot.slane %v1514_v11, 4  ;;  %v1408_v27 = vor.u32 %v1407_v12, %v1404_v5  ;;  %v1423_v28 = vrot.slane %v1421_v13, 5  ;;  %v2426_v29 = vrot.slane %v2414_v3, 9  ;;  %v2407_v3 = vld [vmem:[%s2749_s21 + $0x44] sm:$0x1]  ;;  %v2612_v5 = vld [vmem:[%s2749_s21 + $0x54] sm:$0xff]  }
  0xa0   : > { %v1418_v31 = vor.u32 %v1417_v20, %v1413_v19  ;;  %v1670_v32 = vrot.slane %v2415_v9, 5  ;;  %v1673_v33 = vrot.slane %v2416_v14, 5  ;;  %v2422_v34 = vrot.slane %v2402_v16, 9  ;;  %v489_v4 = vpop.permute.xlu0 %488  ;;  %242 = vst.msk [vmem:[#allocation2 + $0x28] sm:$0xff] %vm236_vm6, %v2606_v50  ;;  %241 = vst.msk [vmem:[#allocation2 + $0x20] sm:$0xff] %vm236_vm6, %v2607_v51 }
  0xa1   : > { %1278 = vrot.lane.b32.xlu0 %v2603_v61, %s2692_s27  ;;  %1557 = vrot.lane.b32.xlu1 %v2394_v54, %s2693_s28  ;;  %v1520_v37 = vsel %vm2805_vm5, %v1515_v26, %v1519_v1  ;;  %v1409_v38 = vrot.slane %v1408_v27, 4  ;;  %v1642_v39 = vrot.slane %v2403_v21, 5  ;;  %v1645_v40 = vrot.slane %v2404_v22, 5  ;;  %v2406_v61 = vld [vmem:[%s2749_s21 + $0x40] sm:$0xf]  ;;  %243 = vst.msk [vmem:[#allocation2 + $0x30] sm:$0xff] %vm236_vm6, %v2608_v52 }
  0xa2   : > { %v2395_v42 = vcombine.low %v1510_v18, %v1520_v37  ;;  %v1419_v43 = vrot.slane %v1418_v31, 4  ;;  %v1671_v44 = vsel %vm2751_vm2, %v2426_v29, %v1670_v32  ;;  %v1672_v45 = vrot.slane %v1670_v32, 4  ;;  %239 = vst.msk [vmem:[#allocation2 + $0x10] sm:$0xff] %vm236_vm6, %v2609_v53  ;;  %244 = vst.msk [vmem:[#allocation2 + $0x38] sm:$0xff] %vm236_vm6, %v2612_v5 }
  0xa3   : > { %v1414_v54 = vsel %vm2805_vm5, %v1409_v38, %v1413_v19  ;;  %v1643_v55 = vsel %vm2751_vm2, %v2422_v34, %v1642_v39  ;;  %v1644_v56 = vrot.slane %v1642_v39, 4  ;;  %v2427_v58 = vrot.slane %v2417_v30, 9  ;;  %240 = vst.msk [vmem:[#allocation2 + $0x18] sm:$0xff] %vm236_vm6, %v2613_v6  ;;  %v2614_v19 = vld [vmem:[%s3421_s1 + $0x10] ss:$0 sps:$4 sm:$0x33]  }
  0xa4   : > { %v1424_v62 = vsel %vm2805_vm5, %v1419_v43, %v1423_v28  ;;  %v1674_v63 = vsel %vm2751_vm2, %v1672_v45, %v1673_v33  ;;  %v1677_v1 = vrot.slane %v2418_v35, 5  ;;  %v1680_v2 = vrot.slane %v2419_v41, 5  ;;  %v499_v14 = vpop.permute.xlu1 %498  ;;  %514 = vst.msk [vmem:[#allocation2 + $0x8] sm:$0xff] %vm512_vm7, %v491_v36  ;;  %513 = vst.msk [vmem:[#allocation2] sm:$0xff] %vm512_vm7, %v489_v4  ;;  %2537 = vmatprep.subr.msk.bf16.mxu0 %vm1792_vm10, %v2614_v19 }
  0xa5   : > { %1549 = vrot.lane.b32.xlu0 %v2390_v17, %s2693_s28  ;;  %1559 = vrot.lane.b32.xlu1 %v2395_v42, %s2693_s28  ;;  %v2391_v8 = vcombine.low %v1414_v54, %v1424_v62  ;;  %v2434_v9 = vcombine.low %v1671_v44, %v1674_v63  ;;  %v1646_v10 = vsel %vm2751_vm2, %v1644_v56, %v1645_v40  ;;  %v2423_v12 = vrot.slane %v2405_v59, 9 }
  0xa6   : > { %v1678_v7 = vsel %vm2751_vm2, %v2427_v58, %v1677_v1  ;;  %v1679_v11 = vrot.slane %v1677_v1, 4  ;;  %v1649_v13 = vrot.slane %v2406_v61, 5  ;;  %v1652_v16 = vrot.slane %v2407_v3, 5  ;;  %518 = vst.msk [vmem:[#allocation2 + $0x28] sm:$0xff] %vm512_vm7, %v499_v14  ;;  %2538 = vmatprep.subr.msk.bf16.mxu1 %vm1792_vm10, %v2614_v19 }
  0xa7   : > { %v2430_v20 = vcombine.low %v1643_v55, %v1646_v10  ;;  %678 = vst.msk [vmem:[#allocation2 + $0x8] sm:$0xff] %vm676_vm8, %v3163_v23  ;;  %677 = vst.msk [vmem:[#allocation2] sm:$0xff] %vm676_vm8, %v3137_v46  ;;  %v1794_v0 = vsel %vm1792_vm10, %v2614_v19, 0 }
  0xa8   : > { %v1681_v17 = vsel %vm2751_vm2, %v1679_v11, %v1680_v2  ;;  %v1651_v18 = vrot.slane %v1649_v13, 4  ;;  %v1650_v22 = vsel %vm2751_vm2, %v2423_v12, %v1649_v13  ;;  %682 = vst.msk [vmem:[#allocation2 + $0x28] sm:$0xff] %vm676_vm8, %v3148_v60  ;;  %2514 = vmatpush3.bf16.msra.mxu0 %v1794_v0  ;;  %2536 = vmatpush3.bf16.msra.mxu1 %v1794_v0 }
  0xa9   : > { %1551 = vrot.lane.b32.xlu0 %v2391_v8, %s2693_s28  ;;  %1718 = vrot.lane.b32.xlu1 %v2434_v9, %s2694_s3  ;;  %v2435_v21 = vcombine.low %v1678_v7, %v1681_v17  ;;  %770 = vst.msk [vmem:[#allocation2] sm:$0xff] %vm769_vm9, %v3102_v47  ;;  %771 = vst.msk [vmem:[#allocation2 + $0x8] sm:$0xff] %vm769_vm9, %v3125_v15 }
  0xaa   : > { %v1653_v26 = vsel %vm2751_vm2, %v1651_v18, %v1652_v16  ;;  %v497_v27 = vpop.permute.xlu0 %496  ;;  %775 = vst.msk [vmem:[#allocation2 + $0x28] sm:$0xff] %vm769_vm9, %v3112_v57 }
  0xab   : > { %517 = vst.msk [vmem:[#allocation2 + $0x20] sm:$0xff] %vm512_vm7, %v497_v27  ;;  %v2431_v46 = vcombine.low %v1650_v22, %v1653_v26 }
  0xac   : > { %681 = vst.msk [vmem:[#allocation2 + $0x20] sm:$0xff] %vm676_vm8, %v3127_v25 }
  0xad   : > { %1710 = vrot.lane.b32.xlu0 %v2430_v20, %s2694_s3  ;;  %1720 = vrot.lane.b32.xlu1 %v2435_v21, %s2694_s3  ;;  %774 = vst.msk [vmem:[#allocation2 + $0x20] sm:$0xff] %vm769_vm9, %v3084_v24 }
  0xae   : > { %v1027_v47 = vpop.permute.xlu1 %1026 }
  0xaf   : > { %1047 = vst.msk [vmem:[#allocation2 + $0x20] sm:$0xff] %vm1042_vm11, %v1027_v47 }
  0xb1   : > { %1712 = vrot.lane.b32.xlu0 %v2431_v46, %s2694_s3  ;;  %v1019_v57 = vpop.permute.xlu0 %1018 }
  0xb2   : > { %1043 = vst.msk [vmem:[#allocation2] sm:$0xff] %vm1042_vm11, %v1019_v57 }
  0xb6   : > { %v1029_v15 = vpop.permute.xlu1 %1028 }
  0xb7   : > { %1048 = vst.msk [vmem:[#allocation2 + $0x28] sm:$0xff] %vm1042_vm11, %v1029_v15 }
  0xb9   : > { %v1021_v25 = vpop.permute.xlu0 %1020 }
  0xba   : > { %1044 = vst.msk [vmem:[#allocation2 + $0x8] sm:$0xff] %vm1042_vm11, %v1021_v25  ;;  %v1188_v60 = vpop.permute.xlu1 %1187 }
  0xbb   : > { %1208 = vst.msk [vmem:[#allocation2 + $0x20] sm:$0xff] %vm1203_vm12, %v1188_v60 }
  0xbd   : > { %v1180_v24 = vpop.permute.xlu0 %1179 }
  0xbe   : > { %1204 = vst.msk [vmem:[#allocation2] sm:$0xff] %vm1203_vm12, %v1180_v24  ;;  %v1190_v23 = vpop.permute.xlu1 %1189 }
  0xbf   : > { %1209 = vst.msk [vmem:[#allocation2 + $0x28] sm:$0xff] %vm1203_vm12, %v1190_v23 }
  0xc1   : > { %v1182_v28 = vpop.permute.xlu0 %1181 }
  0xc2   : > { %1205 = vst.msk [vmem:[#allocation2 + $0x8] sm:$0xff] %vm1203_vm12, %v1182_v28  ;;  %v1281_v29 = vpop.permute.xlu1 %1280 }
  0xc3   : > { %1301 = vst.msk [vmem:[#allocation2 + $0x20] sm:$0xff] %vm1296_vm13, %v1281_v29 }
  0xc5   : > { %v1273_v30 = vpop.permute.xlu0 %1272 }
  0xc6   : > { %1297 = vst.msk [vmem:[#allocation2] sm:$0xff] %vm1296_vm13, %v1273_v30  ;;  %v1283_v31 = vpop.permute.xlu1 %1282 }
  0xc7   : > { %1302 = vst.msk [vmem:[#allocation2 + $0x28] sm:$0xff] %vm1296_vm13, %v1283_v31 }
  0xc9   : > { %v1275_v32 = vpop.permute.xlu0 %1274 }
  0xca   : > { %1298 = vst.msk [vmem:[#allocation2 + $0x8] sm:$0xff] %vm1296_vm13, %v1275_v32  ;;  %v1554_v33 = vpop.permute.xlu1 %1553 }
  0xcb   : > { %1574 = vst.msk [vmem:[#allocation2 + $0x20] sm:$0xff] %vm1569_vm14, %v1554_v33 }
  0xcd   : > { %v1546_v34 = vpop.permute.xlu0 %1545 }
  0xce   : > { %1570 = vst.msk [vmem:[#allocation2] sm:$0xff] %vm1569_vm14, %v1546_v34  ;;  %v1556_v35 = vpop.permute.xlu1 %1555 }
  0xcf   : > { %1575 = vst.msk [vmem:[#allocation2 + $0x28] sm:$0xff] %vm1569_vm14, %v1556_v35 }
  0xd2   : > { %v1715_v36 = vpop.permute.xlu1 %1714 }
  0xd3   : > { %v1548_v37 = vpop.permute.xlu0 %1547  ;;  %1735 = vst.msk [vmem:[#allocation2 + $0x20] sm:$0xff] %vm1730_vm15, %v1715_v36 }
  0xd4   : > { %1571 = vst.msk [vmem:[#allocation2 + $0x8] sm:$0xff] %vm1569_vm14, %v1548_v37 }
  0xd7   : > { %v1707_v38 = vpop.permute.xlu0 %1706 }
  0xd8   : > { %1731 = vst.msk [vmem:[#allocation2] sm:$0xff] %vm1730_vm15, %v1707_v38 }
  0xda   : > { %v501_v39 = vpop.permute.xlu1 %500  ;;  %v1743_v40 = vld [vmem:[#allocation2 + $0x20] sm:$0xff] }
  0xdb   : > { %519 = vst.msk [vmem:[#allocation2 + $0x30] sm:$0xff] %vm512_vm7, %v501_v39  ;;  %2523 = vmatprep.mubr.msk.bf16.mxu1 %vm1767_vm0, %v1743_v40 }
  0xdd   : > { %v493_v41 = vpop.permute.xlu0 %492 }
  0xde   : > { %515 = vst.msk [vmem:[#allocation2 + $0x10] sm:$0xff] %vm512_vm7, %v493_v41  ;;  %v1717_v42 = vpop.permute.xlu1 %1716 }
  0xdf   : > { %1736 = vst.msk [vmem:[#allocation2 + $0x28] sm:$0xff] %vm1730_vm15, %v1717_v42  ;;  %v1739_v43 = vld [vmem:[#allocation2] sm:$0xff] }
  0xe0   : > { %2515 = vmatprep.mubr.msk.bf16.mxu0 %vm1767_vm0, %v1739_v43 }
  0xe1   : > { %v1709_v44 = vpop.permute.xlu0 %1708 }
  0xe2   : > { %1732 = vst.msk [vmem:[#allocation2 + $0x8] sm:$0xff] %vm1730_vm15, %v1709_v44 }
  0xe6   : > { %v1744_v45 = vld [vmem:[#allocation2 + $0x28] sm:$0xff] }
  0xe7   : > { %v503_v48 = vpop.permute.xlu1 %502  ;;  %2524 = vmatmul.mubr.msk.bf16.vlgmr.msra.gmra.mrb[0].mxu1 %vm1767_vm0, %v1744_v45 }
  0xe8   : > { %520 = vst.msk [vmem:[#allocation2 + $0x38] sm:$0xff] %vm512_vm7, %v503_v48 }
  0xe9   : > { %v495_v49 = vpop.permute.xlu0 %494  ;;  %v1740_v50 = vld [vmem:[#allocation2 + $0x8] sm:$0xff] }
  0xea   : > { %516 = vst.msk [vmem:[#allocation2 + $0x18] sm:$0xff] %vm512_vm7, %v495_v49  ;;  %2516 = vmatmul.mubr.msk.bf16.vlgmr.msra.gmra.mrb[0].mxu0 %vm1767_vm0, %v1740_v50 }
  0xeb   : > { %v665_v51 = vpop.permute.xlu1 %664 }
  0xec   : > { %683 = vst.msk [vmem:[#allocation2 + $0x30] sm:$0xff] %vm676_vm8, %v665_v51 }
  0xed   : > { %v657_v52 = vpop.permute.xlu0 %656 }
  0xee   : > { %679 = vst.msk [vmem:[#allocation2 + $0x10] sm:$0xff] %vm676_vm8, %v657_v52 }
  0xef   : > { %v667_v53 = vpop.permute.xlu1 %666 }
  0xf0   : > { %684 = vst.msk [vmem:[#allocation2 + $0x38] sm:$0xff] %vm676_vm8, %v667_v53 }
  0xf1   : > { %v659_v54 = vpop.permute.xlu0 %658 }
  0xf2   : > { %680 = vst.msk [vmem:[#allocation2 + $0x18] sm:$0xff] %vm676_vm8, %v659_v54 }
  0xf3   : > { %v758_v55 = vpop.permute.xlu1 %757 }
  0xf4   : > { %776 = vst.msk [vmem:[#allocation2 + $0x30] sm:$0xff] %vm769_vm9, %v758_v55 }
  0xf5   : > { %v750_v56 = vpop.permute.xlu0 %749 }
  0xf6   : > { %772 = vst.msk [vmem:[#allocation2 + $0x10] sm:$0xff] %vm769_vm9, %v750_v56 }
  0xf7   : > { %v760_v58 = vpop.permute.xlu1 %759 }
  0xf8   : > { %777 = vst.msk [vmem:[#allocation2 + $0x38] sm:$0xff] %vm769_vm9, %v760_v58 }
  0xf9   : > { %v752_v59 = vpop.permute.xlu0 %751 }
  0xfa   : > { %773 = vst.msk [vmem:[#allocation2 + $0x18] sm:$0xff] %vm769_vm9, %v752_v59 }
  0xfb   : > { %v1031_v61 = vpop.permute.xlu1 %1030 }
  0xfc   : > { %1049 = vst.msk [vmem:[#allocation2 + $0x30] sm:$0xff] %vm1042_vm11, %v1031_v61 }
  0xfd   : > { %v1023_v62 = vpop.permute.xlu0 %1022 }
  0xfe   : > { %1045 = vst.msk [vmem:[#allocation2 + $0x10] sm:$0xff] %vm1042_vm11, %v1023_v62 }
  0xff   : > { %v1033_v63 = vpop.permute.xlu1 %1032 }
 0x100   : > { %1050 = vst.msk [vmem:[#allocation2 + $0x38] sm:$0xff] %vm1042_vm11, %v1033_v63 }
 0x103   : > { %v1025_v1 = vpop.permute.xlu0 %1024  ;;  %v1192_v2 = vpop.permute.xlu1 %1191 }
 0x104   : > { %1046 = vst.msk [vmem:[#allocation2 + $0x18] sm:$0xff] %vm1042_vm11, %v1025_v1 }
 0x105   : > { %1210 = vst.msk [vmem:[#allocation2 + $0x30] sm:$0xff] %vm1203_vm12, %v1192_v2 }
 0x107   : > { %v1184_v3 = vpop.permute.xlu0 %1183  ;;  %v1194_v4 = vpop.permute.xlu1 %1193 }
 0x108   : > { %1206 = vst.msk [vmem:[#allocation2 + $0x10] sm:$0xff] %vm1203_vm12, %v1184_v3  ;;  %1211 = vst.msk [vmem:[#allocation2 + $0x38] sm:$0xff] %vm1203_vm12, %v1194_v4 }
 0x10b   : > { %v1186_v5 = vpop.permute.xlu0 %1185  ;;  %v1285_v6 = vpop.permute.xlu1 %1284 }
 0x10c   : > { %1207 = vst.msk [vmem:[#allocation2 + $0x18] sm:$0xff] %vm1203_vm12, %v1186_v5 }
 0x10d   : > { %1303 = vst.msk [vmem:[#allocation2 + $0x30] sm:$0xff] %vm1296_vm13, %v1285_v6 }
 0x10f   : > { %v1277_v8 = vpop.permute.xlu0 %1276  ;;  %v1287_v9 = vpop.permute.xlu1 %1286 }
 0x110   : > { %1299 = vst.msk [vmem:[#allocation2 + $0x10] sm:$0xff] %vm1296_vm13, %v1277_v8  ;;  %1304 = vst.msk [vmem:[#allocation2 + $0x38] sm:$0xff] %vm1296_vm13, %v1287_v9 }
 0x113   : > { %v1279_v10 = vpop.permute.xlu0 %1278  ;;  %v1558_v7 = vpop.permute.xlu1 %1557 }
 0x114   : > { %1300 = vst.msk [vmem:[#allocation2 + $0x18] sm:$0xff] %vm1296_vm13, %v1279_v10 }
 0x115   : > { %1576 = vst.msk [vmem:[#allocation2 + $0x30] sm:$0xff] %vm1569_vm14, %v1558_v7 }
 0x117   : > { %v1550_v11 = vpop.permute.xlu0 %1549  ;;  %v1560_v12 = vpop.permute.xlu1 %1559 }
 0x118   : > { %1572 = vst.msk [vmem:[#allocation2 + $0x10] sm:$0xff] %vm1569_vm14, %v1550_v11  ;;  %1577 = vst.msk [vmem:[#allocation2 + $0x38] sm:$0xff] %vm1569_vm14, %v1560_v12 }
 0x11b   : > { %v1552_v13 = vpop.permute.xlu0 %1551  ;;  %v1719_v14 = vpop.permute.xlu1 %1718 }
 0x11c   : > { %1573 = vst.msk [vmem:[#allocation2 + $0x18] sm:$0xff] %vm1569_vm14, %v1552_v13 }
 0x11d   : > { %1737 = vst.msk [vmem:[#allocation2 + $0x30] sm:$0xff] %vm1730_vm15, %v1719_v14 }
 0x11f   : > { %v1711_v16 = vpop.permute.xlu0 %1710  ;;  %v1721_v17 = vpop.permute.xlu1 %1720 }
 0x120   : > { %1733 = vst.msk [vmem:[#allocation2 + $0x10] sm:$0xff] %vm1730_vm15, %v1711_v16  ;;  %1738 = vst.msk [vmem:[#allocation2 + $0x38] sm:$0xff] %vm1730_vm15, %v1721_v17 }
 0x123   : > { %v1713_v18 = vpop.permute.xlu0 %1712 }
 0x124   : > { %v1745_v19 = vld [vmem:[#allocation2 + $0x30] sm:$0xff]  ;;  %1734 = vst.msk [vmem:[#allocation2 + $0x18] sm:$0xff] %vm1730_vm15, %v1713_v18 }
 0x125   : > { %2527 = vmatprep.mubr.msk.bf16.mxu1 %vm1767_vm0, %v1745_v19 }
 0x127   : > { %v1741_v20 = vld [vmem:[#allocation2 + $0x10] sm:$0xff]  ;;  %v1746_v21 = vld [vmem:[#allocation2 + $0x38] sm:$0xff] }
 0x128   : > { %2519 = vmatprep.mubr.msk.bf16.mxu0 %vm1767_vm0, %v1741_v20  ;;  %2528 = vmatmul.mubr.msk.bf16.gmra.mrb[4].mxu1 %vm1767_vm0, %v1746_v21 }
 0x12b   : > { %v1742_v22 = vld [vmem:[#allocation2 + $0x18] sm:$0xff] }
 0x12c   : > { %2520 = vmatmul.mubr.msk.bf16.gmra.mrb[4].mxu0 %vm1767_vm0, %v1742_v22 }
 0x1ba   : > { %v2525_v26 = vpop.f32.mrb[0].mxu1 }
 0x1bb   : > { %v1903_v27 = vmin.f32 %v2525_v26, 0.0  ;;  %v3293_v0 = vpop.f32.mrb[1].mxu1  ;;  %vm1983_vm2 = vcmp.gt.f32.partialorder %v2525_v26, 0.0 }
 0x1bc   : > { %v1901_v46 = vmin.f32 %v3293_v0, 0.0  ;;  %v3296_v47 = vpop.f32.mrb[2].mxu1  ;;  %vm1981_vm3 = vcmp.gt.f32.partialorder %v3293_v0, 0.0 }
 0x1bd   : > { %v3298_v57 = vpop.f32.mrb[0].mxu0  ;;  %v1929_v15 = vmul.f32 1.442695, %v1903_v27  ;;  %v1904_v25 = vmin.f32 %v3296_v47, 0.0  ;;  %v3301_v60 = vpop.f32.mrb[3].mxu1  ;;  %vm1984_vm5 = vcmp.gt.f32.partialorder %v3296_v47, 0.0 }
 0x1be   : > { %v1895_v24 = vmin.f32 %v3298_v57, 0.0  ;;  %v3304_v23 = vpop.f32.mrb[1].mxu0  ;;  %v1925_v28 = vmul.f32 1.442695, %v1901_v46  ;;  %v1902_v29 = vmin.f32 %v3301_v60, 0.0  ;;  %vm1975_vm4 = vcmp.gt.f32.partialorder %v3298_v57, 0.0 }
 0x1bf   : > { %2615 = vpow2.f32 %v1929_v15  ;;  %v1893_v30 = vmin.f32 %v3304_v23, 0.0  ;;  %v3309_v31 = vpop.f32.mrb[2].mxu0  ;;  %v1931_v32 = vmul.f32 1.442695, %v1904_v25  ;;  %vm1973_vm6 = vcmp.gt.f32.partialorder %v3304_v23, 0.0 }
 0x1c0   : > { %v1913_v33 = vmul.f32 1.442695, %v1895_v24  ;;  %2617 = vpow2.f32 %v1925_v28  ;;  %v1896_v34 = vmin.f32 %v3309_v31, 0.0  ;;  %v3312_v35 = vpop.f32.mrb[3].mxu0  ;;  %v1927_v39 = vmul.f32 1.442695, %v1902_v29 }
 0x1c1   : > { %v1909_v36 = vmul.f32 1.442695, %v1893_v30  ;;  %2619 = vpow2.f32 %v1931_v32  ;;  %v1894_v37 = vmin.f32 %v3312_v35, 0.0  ;;  %vm1976_vm7 = vcmp.gt.f32.partialorder %v3309_v31, 0.0 }
 0x1c2   : > { %2621 = vpow2.f32 %v1913_v33  ;;  %v1915_v38 = vmul.f32 1.442695, %v1896_v34  ;;  %vm1974_vm8 = vcmp.gt.f32.partialorder %v3312_v35, 0.0  ;;  %vm1982_vm9 = vcmp.gt.f32.partialorder %v3301_v60, 0.0 }
 0x1c3   : > { %2623 = vpow2.f32 %v1909_v36  ;;  %v1911_v40 = vmul.f32 1.442695, %v1894_v37 }
 0x1c4   : > { %2625 = vpow2.f32 %v1915_v38 }
 0x1c5   : > { %2627 = vpow2.f32 %v1911_v40 }
 0x1c6   : > { %2629 = vpow2.f32 %v1927_v39 }
 0x1c9   : > { %v2616_v41 = vpop.eup %2615 }
 0x1ca   : > { %v2618_v42 = vpop.eup %2617  ;;  %v2457_v43 = vadd.f32 -1.0, %v2616_v41 }
 0x1cb   : > { %v2620_v44 = vpop.eup %2619  ;;  %v2455_v45 = vadd.f32 -1.0, %v2618_v42 }
 0x1cc   : > { %v2622_v48 = vpop.eup %2621  ;;  %v1967_v49 = vmul.f32 1.6732632, %v2457_v43  ;;  %v2458_v50 = vadd.f32 -1.0, %v2620_v44 }
 0x1cd   : > { %v2624_v51 = vpop.eup %2623  ;;  %v2449_v52 = vadd.f32 -1.0, %v2622_v48  ;;  %v1965_v53 = vmul.f32 1.6732632, %v2455_v45 }
 0x1ce   : > { %v2626_v54 = vpop.eup %2625  ;;  %v1999_v55 = vsel %vm1983_vm2, %v2525_v26, %v1967_v49  ;;  %v2447_v56 = vadd.f32 -1.0, %v2624_v51  ;;  %v1968_v58 = vmul.f32 1.6732632, %v2458_v50 }
 0x1cf   : > { %v2628_v59 = vpop.eup %2627  ;;  %v1959_v61 = vmul.f32 1.6732632, %v2449_v52  ;;  %v2015_v62 = vmul.f32 1.050701, %v1999_v55  ;;  %v1997_v63 = vsel %vm1981_vm3, %v3293_v0, %v1965_v53  ;;  %v2450_v1 = vadd.f32 -1.0, %v2626_v54 }
 0x1d0   : > { %v2630_v2 = vpop.eup %2629  ;;  %v1957_v3 = vmul.f32 1.6732632, %v2447_v56  ;;  %v2013_v4 = vmul.f32 1.050701, %v1997_v63  ;;  %v2000_v5 = vsel %vm1984_vm5, %v3296_v47, %v1968_v58  ;;  %v2448_v6 = vadd.f32 -1.0, %v2628_v59 }
 0x1d1   : > { %v1991_v8 = vsel %vm1975_vm4, %v3298_v57, %v1959_v61  ;;  %v2492_v9 = vpack.c.bf16 %v2015_v62, %v2015_v62  ;;  %v1960_v10 = vmul.f32 1.6732632, %v2450_v1  ;;  %v2016_v7 = vmul.f32 1.050701, %v2000_v5 }
 0x1d2   : > { %v2007_v11 = vmul.f32 1.050701, %v1991_v8  ;;  %v1989_v12 = vsel %vm1973_vm6, %v3304_v23, %v1957_v3  ;;  %v2490_v13 = vpack.c.bf16 %v2013_v4, %v2013_v4  ;;  %v1958_v14 = vmul.f32 1.6732632, %v2448_v6 }
 0x1d3   : > { %2096 = vst.msk [vmem:[%s3331_s19 + $0x28] sm:$0xf] %vm2085_vm1, %v2492_v9  ;;  %v2005_v16 = vmul.f32 1.050701, %v1989_v12  ;;  %v1992_v17 = vsel %vm1976_vm7, %v3309_v31, %v1960_v10  ;;  %v2493_v18 = vpack.c.bf16 %v2016_v7, %v2016_v7  ;;  %v2456_v19 = vadd.f32 -1.0, %v2630_v2 }
 0x1d4   : > { %v2484_v20 = vpack.c.bf16 %v2007_v11, %v2007_v11  ;;  %2094 = vst.msk [vmem:[%s3331_s19 + $0x20] sm:$0xf] %vm2085_vm1, %v2490_v13  ;;  %v2008_v21 = vmul.f32 1.050701, %v1992_v17  ;;  %v1990_v22 = vsel %vm1974_vm8, %v3312_v35, %v1958_v14 }
 0x1d5   : > { %v2482_v26 = vpack.c.bf16 %v2005_v16, %v2005_v16  ;;  %2097 = vst.msk [vmem:[%s3331_s19 + $0x2c] sm:$0xf] %vm2085_vm1, %v2493_v18  ;;  %v2006_v27 = vmul.f32 1.050701, %v1990_v22  ;;  %v1966_v0 = vmul.f32 1.6732632, %v2456_v19 }
 0x1d6   : > { %2088 = vst.msk [vmem:[%s3331_s19 + $0x8] sm:$0xf] %vm2085_vm1, %v2484_v20  ;;  %v2485_v46 = vpack.c.bf16 %v2008_v21, %v2008_v21 }
 0x1d7   : > { %2086 = vst.msk [vmem:[%s3331_s19] sm:$0xf] %vm2085_vm1, %v2482_v26  ;;  %v2483_v47 = vpack.c.bf16 %v2006_v27, %v2006_v27  ;;  %v1998_v57 = vsel %vm1982_vm9, %v3301_v60, %v1966_v0 }
 0x1d8   : > { %2089 = vst.msk [vmem:[%s3331_s19 + $0xc] sm:$0xf] %vm2085_vm1, %v2485_v46  ;;  %v2014_v15 = vmul.f32 1.050701, %v1998_v57 }
 0x1d9   : > { %2087 = vst.msk [vmem:[%s3331_s19 + $0x4] sm:$0xf] %vm2085_vm1, %v2483_v47 }
 0x1da   : > { %v2491_v25 = vpack.c.bf16 %v2014_v15, %v2014_v15 }
 0x1dc   : > { %2095 = vst.msk [vmem:[%s3331_s19 + $0x24] sm:$0xf] %vm2085_vm1, %v2491_v25 }
 0x1fb   : > { %v2529_v24 = vpop.f32.mrb[4].mxu1 }
 0x1fc   : > { %v1907_v23 = vmin.f32 %v2529_v24, 0.0  ;;  %v1878_v28 = vpop.f32.mrb[5].mxu1  ;;  %vm1987_vm10 = vcmp.gt.f32.partialorder %v2529_v24, 0.0 }
 0x1fd   : > { %v1905_v29 = vmin.f32 %v1878_v28, 0.0  ;;  %v2530_v30 = vpop.f32.mrb[6].mxu1  ;;  %vm1985_vm11 = vcmp.gt.f32.partialorder %v1878_v28, 0.0 }
 0x1fe   : > { %v1937_v31 = vmul.f32 1.442695, %v1907_v23  ;;  %v1908_v32 = vmin.f32 %v2530_v30, 0.0  ;;  %v3366_v33 = vpop.f32.mrb[7].mxu1  ;;  %vm1988_vm12 = vcmp.gt.f32.partialorder %v2530_v30, 0.0 }
 0x1ff   : > { %v2521_v34 = vpop.f32.mrb[4].mxu0  ;;  %v1933_v35 = vmul.f32 1.442695, %v1905_v29  ;;  %v1906_v60 = vmin.f32 %v3366_v33, 0.0  ;;  %vm1986_vm13 = vcmp.gt.f32.partialorder %v3366_v33, 0.0 }
 0x200   : > { %v1899_v36 = vmin.f32 %v2521_v34, 0.0  ;;  %2631 = vpow2.f32 %v1937_v31  ;;  %v1846_v37 = vpop.f32.mrb[5].mxu0  ;;  %v1939_v38 = vmul.f32 1.442695, %v1908_v32  ;;  %vm1979_vm14 = vcmp.gt.f32.partialorder %v2521_v34, 0.0 }
 0x201   : > { %v1897_v39 = vmin.f32 %v1846_v37, 0.0  ;;  %2633 = vpow2.f32 %v1933_v35  ;;  %v3369_v40 = vpop.f32.mrb[6].mxu0  ;;  %v1935_v41 = vmul.f32 1.442695, %v1906_v60  ;;  %vm1977_vm15 = vcmp.gt.f32.partialorder %v1846_v37, 0.0 }
 0x202   : > { %v1921_v42 = vmul.f32 1.442695, %v1899_v36  ;;  %v1900_v43 = vmin.f32 %v3369_v40, 0.0  ;;  %2635 = vpow2.f32 %v1939_v38  ;;  %v3372_v44 = vpop.f32.mrb[7].mxu0  ;;  %vm1980_vm0 = vcmp.gt.f32.partialorder %v3369_v40, 0.0 }
 0x203   : > { %v1917_v45 = vmul.f32 1.442695, %v1897_v39  ;;  %v1898_v48 = vmin.f32 %v3372_v44, 0.0  ;;  %2637 = vpow2.f32 %v1935_v41  ;;  %vm1978_vm2 = vcmp.gt.f32.partialorder %v3372_v44, 0.0 }
 0x204   : > { %2639 = vpow2.f32 %v1921_v42  ;;  %v1923_v49 = vmul.f32 1.442695, %v1900_v43 }
 0x205   : > { %2641 = vpow2.f32 %v1917_v45  ;;  %v1919_v50 = vmul.f32 1.442695, %v1898_v48 }
 0x206   : > { %2643 = vpow2.f32 %v1923_v49 }
 0x207   : > { %2645 = vpow2.f32 %v1919_v50 }
 0x20a   : > { %v2632_v51 = vpop.eup %2631 }
 0x20b   : > { %v2634_v52 = vpop.eup %2633  ;;  %v2461_v53 = vadd.f32 -1.0, %v2632_v51 }
 0x20c   : > { %v2636_v54 = vpop.eup %2635  ;;  %v2459_v55 = vadd.f32 -1.0, %v2634_v52 }
 0x20d   : > { %v2638_v56 = vpop.eup %2637  ;;  %v1971_v58 = vmul.f32 1.6732632, %v2461_v53  ;;  %v2462_v59 = vadd.f32 -1.0, %v2636_v54 }
 0x20e   : > { %v2640_v61 = vpop.eup %2639  ;;  %v1969_v62 = vmul.f32 1.6732632, %v2459_v55  ;;  %v2460_v63 = vadd.f32 -1.0, %v2638_v56 }
 0x20f   : > { %v2642_v1 = vpop.eup %2641  ;;  %v2453_v2 = vadd.f32 -1.0, %v2640_v61  ;;  %v2003_v3 = vsel %vm1987_vm10, %v2529_v24, %v1971_v58  ;;  %v1972_v4 = vmul.f32 1.6732632, %v2462_v59 }
 0x210   : > { %v2644_v5 = vpop.eup %2643  ;;  %v2019_v6 = vmul.f32 1.050701, %v2003_v3  ;;  %v2451_v8 = vadd.f32 -1.0, %v2642_v1  ;;  %v2001_v9 = vsel %vm1985_vm11, %v1878_v28, %v1969_v62  ;;  %v1970_v10 = vmul.f32 1.6732632, %v2460_v63 }
 0x211   : > { %v2646_v7 = vpop.eup %2645  ;;  %v1963_v11 = vmul.f32 1.6732632, %v2453_v2  ;;  %v2017_v12 = vmul.f32 1.050701, %v2001_v9  ;;  %v2454_v13 = vadd.f32 -1.0, %v2644_v5  ;;  %v2004_v14 = vsel %vm1988_vm12, %v2530_v30, %v1972_v4 }
 0x212   : > { %v2496_v16 = vpack.c.bf16 %v2019_v6, %v2019_v6  ;;  %v1961_v17 = vmul.f32 1.6732632, %v2451_v8  ;;  %v2020_v18 = vmul.f32 1.050701, %v2004_v14  ;;  %v2452_v19 = vadd.f32 -1.0, %v2646_v7 }
 0x213   : > { %v1995_v20 = vsel %vm1979_vm14, %v2521_v34, %v1963_v11  ;;  %v2494_v21 = vpack.c.bf16 %v2017_v12, %v2017_v12  ;;  %v1964_v22 = vmul.f32 1.6732632, %v2454_v13  ;;  %v2002_v26 = vsel %vm1986_vm13, %v3366_v33, %v1970_v10 }
 0x214   : > { %v2011_v27 = vmul.f32 1.050701, %v1995_v20  ;;  %2100 = vst.msk [vmem:[%s3331_s19 + $0x38] sm:$0xf] %vm2085_vm1, %v2496_v16  ;;  %v1993_v0 = vsel %vm1977_vm15, %v1846_v37, %v1961_v17  ;;  %v2497_v46 = vpack.c.bf16 %v2020_v18, %v2020_v18  ;;  %v1962_v47 = vmul.f32 1.6732632, %v2452_v19 }
 0x215   : > { %v2009_v57 = vmul.f32 1.050701, %v1993_v0  ;;  %2098 = vst.msk [vmem:[%s3331_s19 + $0x30] sm:$0xf] %vm2085_vm1, %v2494_v21  ;;  %v1996_v15 = vsel %vm1980_vm0, %v3369_v40, %v1964_v22  ;;  %v2018_v25 = vmul.f32 1.050701, %v2002_v26 }
 0x216   : > { %v2488_v24 = vpack.c.bf16 %v2011_v27, %v2011_v27  ;;  %v2012_v23 = vmul.f32 1.050701, %v1996_v15  ;;  %2101 = vst.msk [vmem:[%s3331_s19 + $0x3c] sm:$0xf] %vm2085_vm1, %v2497_v46  ;;  %v1994_v28 = vsel %vm1978_vm2, %v3372_v44, %v1962_v47 }
 0x217   : > { %v2486_v29 = vpack.c.bf16 %v2009_v57, %v2009_v57  ;;  %v2010_v30 = vmul.f32 1.050701, %v1994_v28  ;;  %v2495_v31 = vpack.c.bf16 %v2018_v25, %v2018_v25 }
 0x218   : > { %2092 = vst.msk [vmem:[%s3331_s19 + $0x18] sm:$0xf] %vm2085_vm1, %v2488_v24  ;;  %v2489_v32 = vpack.c.bf16 %v2012_v23, %v2012_v23 }
 0x219   : > { %2090 = vst.msk [vmem:[%s3331_s19 + $0x10] sm:$0xf] %vm2085_vm1, %v2486_v29  ;;  %v2487_v33 = vpack.c.bf16 %v2010_v30, %v2010_v30  ;;  %2099 = vst.msk [vmem:[%s3331_s19 + $0x34] sm:$0xf] %vm2085_vm1, %v2495_v31 }
 0x21a   : > { %2093 = vst.msk [vmem:[%s3331_s19 + $0x1c] sm:$0xf] %vm2085_vm1, %v2489_v32 }
 0x21b   : > { %2091 = vst.msk [vmem:[%s3331_s19 + $0x14] sm:$0xf] %vm2085_vm1, %v2487_v33 }
 0x21c PF: > { %s12_s13 = sadd.s32 1, %s2685_s13   ;;  %s3427_s9 = smov %s2677_s11 }
 0x21d   : > { %p9_p7 = scmp.ge.s32.totalorder %s12_s13, 6   ;;  %s3428_s10 = smov %s2681_s12 }
 0x21e   : > { %s3429_s11 = smov %s3432_s14  ;;  %s3430_s12 = smov %s3436_s15 }
 0x21f   :  { %11 = sbr.rel (!%p9_p7) target bundleno = 3 (0x3), region = 61 }

</bundles_post_ra>
